<compile_context>
chip_gen: v7x
topology: tpu7x:2x2x1
jax: 0.10.0
libtpu: 0.0.40
codegen_flags: <defaults>
</compile_context>

<pallas_src>
import functools

import jax
import jax.numpy as jnp
from jax.experimental import pallas as pl
from jax.experimental.pallas import tpu as pltpu

NUM_HIDDEN_LAYERS = 4  # matches DynamicsDecoder default num_hidden_layers=4


def _round_up(n, m):
    return ((n + m - 1) // m) * m


def _num_tensorcores():
    """Best-effort TensorCores-per-device count (perf heuristic only).

    v5e / v6e ("lite" chips) expose a single TensorCore per device, so the
    whole batch should be one grid step.  v7x (2 TCs) and v4/v5p megacore
    benefit from one >=16-row tile per core on a "parallel" batch axis.
    Either answer is functionally correct; this only affects performance.
    """
    try:
        kind = jax.devices()[0].device_kind.lower()
    except Exception:  # no device info -> safest (and correct) default
        return 1
    if any(tag in kind for tag in ("lite", "v5e", "v6e", "v2", "v3")):
        return 1
    return 2


def mlp_kernel(x_ref, w_in_ref, b_in_ref, w_h_ref, b_h_ref, w_out_ref,
               b_out_ref, o_ref, *, n_splits):
    """Whole-MLP hot path: 6 bf16 matmuls (f32 acc) + f32 bias/ReLU epilogues.

    The batch tile is statically split into `n_splits` independent row chunks
    so one chunk's bias-add/ReLU/bf16-cast (VPU) can be co-issued with the
    other chunk's matmul pushes (MXU) in the same VLIW bundles.
    """
    tile = x_ref.shape[0]
    rows = tile // n_splits

    w_in = w_in_ref[...]
    b_in = b_in_ref[...]
    w_out = w_out_ref[...]
    b_out = b_out_ref[...]

    # Input layer + ReLU per chunk (bf16 operands, f32 MXU accumulation).
    hs = []
    for s in range(n_splits):
        xs = x_ref[s * rows:(s + 1) * rows, :]
        h = jnp.dot(xs, w_in, preferred_element_type=jnp.float32)
        hs.append(jnp.maximum(h + b_in, 0.0).astype(jnp.bfloat16))

    # Hidden layers + ReLU (static unroll over layers; chunks stay independent).
    for l in range(NUM_HIDDEN_LAYERS):
        w_l = w_h_ref[l]
        b_l = b_h_ref[l]
        hs = [jnp.maximum(
                  jnp.dot(h, w_l, preferred_element_type=jnp.float32) + b_l,
                  0.0).astype(jnp.bfloat16)
              for h in hs]

    # Output layer (no activation); lane-dense (128-padded) f32 store.
    for s in range(n_splits):
        out = jnp.dot(hs[s], w_out, preferred_element_type=jnp.float32) + b_out
        o_ref[s * rows:(s + 1) * rows, :] = out.astype(o_ref.dtype)


def dynamics_decoder_forward(x, params, *, max_tile_b=512):
    B, latent_dim = x.shape
    hidden_dim = params["w_in"].shape[1]
    param_dim = params["w_out"].shape[1]

    # bf16 operands for MXU peak; biases stay f32 for the epilogue.
    x_bf = x.astype(jnp.bfloat16)
    w_in = params["w_in"].astype(jnp.bfloat16)
    w_h = params["w_h"].astype(jnp.bfloat16)
    w_out = params["w_out"].astype(jnp.bfloat16)
    b_in = params["b_in"].astype(jnp.float32)
    b_h = params["b_h"].astype(jnp.float32)
    b_out = params["b_out"].astype(jnp.float32)

    # Lane-dense output: zero-pad param_dim up to a multiple of 128 so the
    # final store is an unmasked vst (sliced back to param_dim below).
    p_pad = _round_up(param_dim, 128)
    if p_pad != param_dim:
        w_out = jnp.pad(w_out, ((0, 0), (0, p_pad - param_dim)))
        b_out = jnp.pad(b_out, ((0, 0), (0, p_pad - param_dim)))

    # Generation-aware batch tiling: one tile per available TensorCore,
    # rounded to a multiple of 16 rows (bf16 sublane pack), capped so the
    # tile never gets absurdly large for huge batches.
    n_tc = _num_tensorcores()
    tile_b = min(max_tile_b, _round_up(pl.cdiv(B, n_tc), 16))
    b_pad = _round_up(B, tile_b)
    if b_pad != B:
        x_bf = jnp.pad(x_bf, ((0, b_pad - B), (0, 0)))
    grid = (b_pad // tile_b,)

    # Split the tile into two independent MXU/VPU chains when it is big
    # enough that each half still fills full bf16 sublane groups.
    n_splits = 2 if (tile_b >= 32 and tile_b % 32 == 0) else 1

    flops = 2 * b_pad * (latent_dim * hidden_dim
                         + NUM_HIDDEN_LAYERS * hidden_dim * hidden_dim
                         + hidden_dim * p_pad)
    bytes_accessed = (x_bf.size * 2                              # bf16 acts in
                      + (w_in.size + w_h.size + w_out.size) * 2  # bf16 weights
                      + (b_in.size + b_h.size + b_out.size) * 4  # f32 biases
                      + b_pad * p_pad * 4)                       # f32 out slab

    kernel = functools.partial(mlp_kernel, n_splits=n_splits)

    out = pl.pallas_call(
        kernel,
        out_shape=jax.ShapeDtypeStruct((b_pad, p_pad), jnp.float32),
        grid_spec=pltpu.PrefetchScalarGridSpec(
            num_scalar_prefetch=0,
            grid=grid,
            in_specs=[
                # activations: tiled over batch
                pl.BlockSpec((tile_b, latent_dim), lambda i: (i, 0)),
                # weights / biases: full, resident across all batch tiles
                pl.BlockSpec((latent_dim, hidden_dim), lambda i: (0, 0)),
                pl.BlockSpec((1, hidden_dim), lambda i: (0, 0)),
                pl.BlockSpec((NUM_HIDDEN_LAYERS, hidden_dim, hidden_dim),
                             lambda i: (0, 0, 0)),
                pl.BlockSpec((NUM_HIDDEN_LAYERS, 1, hidden_dim),
                             lambda i: (0, 0, 0)),
                pl.BlockSpec((hidden_dim, p_pad), lambda i: (0, 0)),
                pl.BlockSpec((1, p_pad), lambda i: (0, 0)),
            ],
            out_specs=pl.BlockSpec((tile_b, p_pad), lambda i: (i, 0)),
        ),
        compiler_params=pltpu.CompilerParams(
            # Batch tiles are independent; on multi-core chips they shard
            # across cores ("parallel" is a no-op when grid=(1,)).
            dimension_semantics=("parallel",),
            # Actual footprint is a few MiB; 32 MiB leaves plenty of headroom
            # on every generation (v7x per-TC VMEM is only 64 MiB total).
            vmem_limit_bytes=32 * 1024 * 1024,
        ),
        cost_estimate=pl.CostEstimate(
            flops=flops, transcendentals=0, bytes_accessed=bytes_accessed),
    )(x_bf, w_in, b_in, w_h, b_h, w_out, b_out)

    # Slice off batch-pad rows and lane-pad columns.
    return out[:B, :param_dim]


def init_params(key, latent_dim, hidden_dim, param_dim):
    """Deterministic synthetic init (shapes from DynamicsDecoder.__init__)."""
    ks = jax.random.split(key, 6)
    scale_in = 1.0 / jnp.sqrt(latent_dim)
    scale_h = 1.0 / jnp.sqrt(hidden_dim)
    return dict(
        w_in=scale_in * jax.random.normal(ks[0], (latent_dim, hidden_dim),
                                          jnp.float32),
        b_in=scale_in * jax.random.normal(ks[1], (1, hidden_dim), jnp.float32),
        w_h=scale_h * jax.random.normal(
            ks[2], (NUM_HIDDEN_LAYERS, hidden_dim, hidden_dim), jnp.float32),
        b_h=scale_h * jax.random.normal(
            ks[3], (NUM_HIDDEN_LAYERS, 1, hidden_dim), jnp.float32),
        w_out=scale_h * jax.random.normal(ks[4], (hidden_dim, param_dim),
                                          jnp.float32),
        b_out=scale_h * jax.random.normal(ks[5], (1, param_dim), jnp.float32),
    )


def reference_forward(x, params):
    """Pure-JAX reference mirroring the kernel numerics (bf16 operands, f32 acc).

    Note: parity with the pure-f32 PyTorch module is a separate (looser)
    check; the bf16-per-layer casts here match the kernel exactly.
    """
    bf = jnp.bfloat16
    h = jnp.dot(x.astype(bf), params["w_in"].astype(bf),
                preferred_element_type=jnp.float32)
    h = jnp.maximum(h + params["b_in"], 0.0)
    for l in range(NUM_HIDDEN_LAYERS):
        h = jnp.dot(h.astype(bf), params["w_h"][l].astype(bf),
                    preferred_element_type=jnp.float32)
        h = jnp.maximum(h + params["b_h"][l], 0.0)
    return jnp.dot(h.astype(bf), params["w_out"].astype(bf),
                   preferred_element_type=jnp.float32) + params["b_out"]


if __name__ == "__main__":
    batch = 64        # small test batch (one tile on 1-TC chips, two on v7x)
    latent_dim = 32   # latent code dimension
    hidden_dim = 256  # module default
    param_dim = 8     # dynamics parameter dimension

    key = jax.random.PRNGKey(0)
    kx, kp = jax.random.split(key)
    x = jax.random.normal(kx, (batch, latent_dim), jnp.float32)
    params = init_params(kp, latent_dim, hidden_dim, param_dim)

    out = dynamics_decoder_forward(x, params)
    out = jax.block_until_ready(out)

    ref = reference_forward(x, params)
    assert out.shape == (batch, param_dim)
    assert jnp.allclose(out, ref, atol=1e-2, rtol=1e-2), "mismatch vs reference"
    print("KERNEL_OK")
</pallas_src>

<mosaic_0001>
module attributes {stable_mosaic.version = 11 : i64} {
  func.func @mlp_kernel(%arg0: i32, %arg1: memref<32x32xbf16, #tpu.memory_space<vmem>>, %arg2: memref<32x256xbf16, #tpu.memory_space<vmem>>, %arg3: memref<1x256xf32, #tpu.memory_space<vmem>>, %arg4: memref<4x256x256xbf16, #tpu.memory_space<vmem>>, %arg5: memref<4x1x256xf32, #tpu.memory_space<vmem>>, %arg6: memref<256x128xbf16, #tpu.memory_space<vmem>>, %arg7: memref<1x128xf32, #tpu.memory_space<vmem>>, %arg8: memref<32x128xf32, #tpu.memory_space<vmem>>) attributes {dimension_semantics = [#tpu.dimension_semantics<parallel>], iteration_bounds = array<i64: 2>, scalar_prefetch = 0 : i64, scratch_operands = 0 : i64, tpu.core_type = #tpu.core_type<tc>, window_params = [{transform_indices = @transform_0, window_bounds = array<i64: 32, 32>}, {pipeline_mode = #tpu.pipeline_mode<synchronous>, transform_indices = @transform_1, window_bounds = array<i64: 32, 256>}, {pipeline_mode = #tpu.pipeline_mode<synchronous>, transform_indices = @transform_2, window_bounds = array<i64: 1, 256>}, {pipeline_mode = #tpu.pipeline_mode<synchronous>, transform_indices = @transform_3, window_bounds = array<i64: 4, 256, 256>}, {pipeline_mode = #tpu.pipeline_mode<synchronous>, transform_indices = @transform_4, window_bounds = array<i64: 4, 1, 256>}, {pipeline_mode = #tpu.pipeline_mode<synchronous>, transform_indices = @transform_5, window_bounds = array<i64: 256, 128>}, {pipeline_mode = #tpu.pipeline_mode<synchronous>, transform_indices = @transform_6, window_bounds = array<i64: 1, 128>}, {transform_indices = @transform_7, window_bounds = array<i64: 32, 128>}]} {
    %c0 = arith.constant 0 : index
    %c0_0 = arith.constant 0 : index
    %0 = vector.load %arg2[%c0, %c0_0] : memref<32x256xbf16, #tpu.memory_space<vmem>>, vector<32x256xbf16>
    %c0_1 = arith.constant 0 : index
    %c0_2 = arith.constant 0 : index
    %1 = vector.load %arg3[%c0_1, %c0_2] : memref<1x256xf32, #tpu.memory_space<vmem>>, vector<1x256xf32>
    %c0_3 = arith.constant 0 : index
    %c0_4 = arith.constant 0 : index
    %2 = vector.load %arg6[%c0_3, %c0_4] : memref<256x128xbf16, #tpu.memory_space<vmem>>, vector<256x128xbf16>
    %c0_5 = arith.constant 0 : index
    %c0_6 = arith.constant 0 : index
    %3 = vector.load %arg7[%c0_5, %c0_6] : memref<1x128xf32, #tpu.memory_space<vmem>>, vector<1x128xf32>
    %c0_7 = arith.constant 0 : index
    %c0_8 = arith.constant 0 : index
    %4 = vector.load %arg1[%c0_7, %c0_8] : memref<32x32xbf16, #tpu.memory_space<vmem>>, vector<16x32xbf16>
    %cst = arith.constant dense<0.000000e+00> : vector<16x256xf32>
    %5 = tpu.matmul %4, %0, %cst {dimension_numbers = #tpu.dot_dimension_numbers<[1], [0], [0], [1], [0, 0, 1, 1], [], []>} : vector<16x32xbf16>, vector<32x256xbf16>, vector<16x256xf32> -> vector<16x256xf32>
    %6 = vector.broadcast %1 : vector<1x256xf32> to vector<16x256xf32>
    %7 = arith.addf %5, %6 : vector<16x256xf32>
    %cst_9 = arith.constant 0.000000e+00 : f32
    %8 = vector.broadcast %cst_9 : f32 to vector<16x256xf32>
    %9 = arith.maximumf %7, %8 : vector<16x256xf32>
    %10 = arith.truncf %9 : vector<16x256xf32> to vector<16x256xbf16>
    %c16 = arith.constant 16 : index
    %c0_10 = arith.constant 0 : index
    %11 = vector.load %arg1[%c16, %c0_10] : memref<32x32xbf16, #tpu.memory_space<vmem>>, vector<16x32xbf16>
    %cst_11 = arith.constant dense<0.000000e+00> : vector<16x256xf32>
    %12 = tpu.matmul %11, %0, %cst_11 {dimension_numbers = #tpu.dot_dimension_numbers<[1], [0], [0], [1], [0, 0, 1, 1], [], []>} : vector<16x32xbf16>, vector<32x256xbf16>, vector<16x256xf32> -> vector<16x256xf32>
    %13 = vector.broadcast %1 : vector<1x256xf32> to vector<16x256xf32>
    %14 = arith.addf %12, %13 : vector<16x256xf32>
    %cst_12 = arith.constant 0.000000e+00 : f32
    %15 = vector.broadcast %cst_12 : f32 to vector<16x256xf32>
    %16 = arith.maximumf %14, %15 : vector<16x256xf32>
    %17 = arith.truncf %16 : vector<16x256xf32> to vector<16x256xbf16>
    %c0_13 = arith.constant 0 : index
    %c0_14 = arith.constant 0 : index
    %c0_15 = arith.constant 0 : index
    %18 = vector.load %arg4[%c0_13, %c0_14, %c0_15] : memref<4x256x256xbf16, #tpu.memory_space<vmem>>, vector<1x256x256xbf16>
    %19 = vector.shape_cast %18 : vector<1x256x256xbf16> to vector<256x256xbf16>
    %c0_16 = arith.constant 0 : index
    %c0_17 = arith.constant 0 : index
    %c0_18 = arith.constant 0 : index
    %20 = vector.load %arg5[%c0_16, %c0_17, %c0_18] : memref<4x1x256xf32, #tpu.memory_space<vmem>>, vector<1x1x256xf32>
    %21 = vector.shape_cast %20 : vector<1x1x256xf32> to vector<1x256xf32>
    %cst_19 = arith.constant dense<0.000000e+00> : vector<16x256xf32>
    %22 = tpu.matmul %10, %19, %cst_19 {dimension_numbers = #tpu.dot_dimension_numbers<[1], [0], [0], [1], [0, 0, 1, 1], [], []>} : vector<16x256xbf16>, vector<256x256xbf16>, vector<16x256xf32> -> vector<16x256xf32>
    %23 = vector.broadcast %21 : vector<1x256xf32> to vector<16x256xf32>
    %24 = arith.addf %22, %23 : vector<16x256xf32>
    %cst_20 = arith.constant 0.000000e+00 : f32
    %25 = vector.broadcast %cst_20 : f32 to vector<16x256xf32>
    %26 = arith.maximumf %24, %25 : vector<16x256xf32>
    %27 = arith.truncf %26 : vector<16x256xf32> to vector<16x256xbf16>
    %cst_21 = arith.constant dense<0.000000e+00> : vector<16x256xf32>
    %28 = tpu.matmul %17, %19, %cst_21 {dimension_numbers = #tpu.dot_dimension_numbers<[1], [0], [0], [1], [0, 0, 1, 1], [], []>} : vector<16x256xbf16>, vector<256x256xbf16>, vector<16x256xf32> -> vector<16x256xf32>
    %29 = vector.broadcast %21 : vector<1x256xf32> to vector<16x256xf32>
    %30 = arith.addf %28, %29 : vector<16x256xf32>
    %cst_22 = arith.constant 0.000000e+00 : f32
    %31 = vector.broadcast %cst_22 : f32 to vector<16x256xf32>
    %32 = arith.maximumf %30, %31 : vector<16x256xf32>
    %33 = arith.truncf %32 : vector<16x256xf32> to vector<16x256xbf16>
    %c1 = arith.constant 1 : index
    %c0_23 = arith.constant 0 : index
    %c0_24 = arith.constant 0 : index
    %34 = vector.load %arg4[%c1, %c0_23, %c0_24] : memref<4x256x256xbf16, #tpu.memory_space<vmem>>, vector<1x256x256xbf16>
    %35 = vector.shape_cast %34 : vector<1x256x256xbf16> to vector<256x256xbf16>
    %c1_25 = arith.constant 1 : index
    %c0_26 = arith.constant 0 : index
    %c0_27 = arith.constant 0 : index
    %36 = vector.load %arg5[%c1_25, %c0_26, %c0_27] : memref<4x1x256xf32, #tpu.memory_space<vmem>>, vector<1x1x256xf32>
    %37 = vector.shape_cast %36 : vector<1x1x256xf32> to vector<1x256xf32>
    %cst_28 = arith.constant dense<0.000000e+00> : vector<16x256xf32>
    %38 = tpu.matmul %27, %35, %cst_28 {dimension_numbers = #tpu.dot_dimension_numbers<[1], [0], [0], [1], [0, 0, 1, 1], [], []>} : vector<16x256xbf16>, vector<256x256xbf16>, vector<16x256xf32> -> vector<16x256xf32>
    %39 = vector.broadcast %37 : vector<1x256xf32> to vector<16x256xf32>
    %40 = arith.addf %38, %39 : vector<16x256xf32>
    %cst_29 = arith.constant 0.000000e+00 : f32
    %41 = vector.broadcast %cst_29 : f32 to vector<16x256xf32>
    %42 = arith.maximumf %40, %41 : vector<16x256xf32>
    %43 = arith.truncf %42 : vector<16x256xf32> to vector<16x256xbf16>
    %cst_30 = arith.constant dense<0.000000e+00> : vector<16x256xf32>
    %44 = tpu.matmul %33, %35, %cst_30 {dimension_numbers = #tpu.dot_dimension_numbers<[1], [0], [0], [1], [0, 0, 1, 1], [], []>} : vector<16x256xbf16>, vector<256x256xbf16>, vector<16x256xf32> -> vector<16x256xf32>
    %45 = vector.broadcast %37 : vector<1x256xf32> to vector<16x256xf32>
    %46 = arith.addf %44, %45 : vector<16x256xf32>
    %cst_31 = arith.constant 0.000000e+00 : f32
    %47 = vector.broadcast %cst_31 : f32 to vector<16x256xf32>
    %48 = arith.maximumf %46, %47 : vector<16x256xf32>
    %49 = arith.truncf %48 : vector<16x256xf32> to vector<16x256xbf16>
    %c2 = arith.constant 2 : index
    %c0_32 = arith.constant 0 : index
    %c0_33 = arith.constant 0 : index
    %50 = vector.load %arg4[%c2, %c0_32, %c0_33] : memref<4x256x256xbf16, #tpu.memory_space<vmem>>, vector<1x256x256xbf16>
    %51 = vector.shape_cast %50 : vector<1x256x256xbf16> to vector<256x256xbf16>
    %c2_34 = arith.constant 2 : index
    %c0_35 = arith.constant 0 : index
    %c0_36 = arith.constant 0 : index
    %52 = vector.load %arg5[%c2_34, %c0_35, %c0_36] : memref<4x1x256xf32, #tpu.memory_space<vmem>>, vector<1x1x256xf32>
    %53 = vector.shape_cast %52 : vector<1x1x256xf32> to vector<1x256xf32>
    %cst_37 = arith.constant dense<0.000000e+00> : vector<16x256xf32>
    %54 = tpu.matmul %43, %51, %cst_37 {dimension_numbers = #tpu.dot_dimension_numbers<[1], [0], [0], [1], [0, 0, 1, 1], [], []>} : vector<16x256xbf16>, vector<256x256xbf16>, vector<16x256xf32> -> vector<16x256xf32>
    %55 = vector.broadcast %53 : vector<1x256xf32> to vector<16x256xf32>
    %56 = arith.addf %54, %55 : vector<16x256xf32>
    %cst_38 = arith.constant 0.000000e+00 : f32
    %57 = vector.broadcast %cst_38 : f32 to vector<16x256xf32>
    %58 = arith.maximumf %56, %57 : vector<16x256xf32>
    %59 = arith.truncf %58 : vector<16x256xf32> to vector<16x256xbf16>
    %cst_39 = arith.constant dense<0.000000e+00> : vector<16x256xf32>
    %60 = tpu.matmul %49, %51, %cst_39 {dimension_numbers = #tpu.dot_dimension_numbers<[1], [0], [0], [1], [0, 0, 1, 1], [], []>} : vector<16x256xbf16>, vector<256x256xbf16>, vector<16x256xf32> -> vector<16x256xf32>
    %61 = vector.broadcast %53 : vector<1x256xf32> to vector<16x256xf32>
    %62 = arith.addf %60, %61 : vector<16x256xf32>
    %cst_40 = arith.constant 0.000000e+00 : f32
    %63 = vector.broadcast %cst_40 : f32 to vector<16x256xf32>
    %64 = arith.maximumf %62, %63 : vector<16x256xf32>
    %65 = arith.truncf %64 : vector<16x256xf32> to vector<16x256xbf16>
    %c3 = arith.constant 3 : index
    %c0_41 = arith.constant 0 : index
    %c0_42 = arith.constant 0 : index
    %66 = vector.load %arg4[%c3, %c0_41, %c0_42] : memref<4x256x256xbf16, #tpu.memory_space<vmem>>, vector<1x256x256xbf16>
    %67 = vector.shape_cast %66 : vector<1x256x256xbf16> to vector<256x256xbf16>
    %c3_43 = arith.constant 3 : index
    %c0_44 = arith.constant 0 : index
    %c0_45 = arith.constant 0 : index
    %68 = vector.load %arg5[%c3_43, %c0_44, %c0_45] : memref<4x1x256xf32, #tpu.memory_space<vmem>>, vector<1x1x256xf32>
    %69 = vector.shape_cast %68 : vector<1x1x256xf32> to vector<1x256xf32>
    %cst_46 = arith.constant dense<0.000000e+00> : vector<16x256xf32>
    %70 = tpu.matmul %59, %67, %cst_46 {dimension_numbers = #tpu.dot_dimension_numbers<[1], [0], [0], [1], [0, 0, 1, 1], [], []>} : vector<16x256xbf16>, vector<256x256xbf16>, vector<16x256xf32> -> vector<16x256xf32>
    %71 = vector.broadcast %69 : vector<1x256xf32> to vector<16x256xf32>
    %72 = arith.addf %70, %71 : vector<16x256xf32>
    %cst_47 = arith.constant 0.000000e+00 : f32
    %73 = vector.broadcast %cst_47 : f32 to vector<16x256xf32>
    %74 = arith.maximumf %72, %73 : vector<16x256xf32>
    %75 = arith.truncf %74 : vector<16x256xf32> to vector<16x256xbf16>
    %cst_48 = arith.constant dense<0.000000e+00> : vector<16x256xf32>
    %76 = tpu.matmul %65, %67, %cst_48 {dimension_numbers = #tpu.dot_dimension_numbers<[1], [0], [0], [1], [0, 0, 1, 1], [], []>} : vector<16x256xbf16>, vector<256x256xbf16>, vector<16x256xf32> -> vector<16x256xf32>
    %77 = vector.broadcast %69 : vector<1x256xf32> to vector<16x256xf32>
    %78 = arith.addf %76, %77 : vector<16x256xf32>
    %cst_49 = arith.constant 0.000000e+00 : f32
    %79 = vector.broadcast %cst_49 : f32 to vector<16x256xf32>
    %80 = arith.maximumf %78, %79 : vector<16x256xf32>
    %81 = arith.truncf %80 : vector<16x256xf32> to vector<16x256xbf16>
    %cst_50 = arith.constant dense<0.000000e+00> : vector<16x128xf32>
    %82 = tpu.matmul %75, %2, %cst_50 {dimension_numbers = #tpu.dot_dimension_numbers<[1], [0], [0], [1], [0, 0, 1, 1], [], []>} : vector<16x256xbf16>, vector<256x128xbf16>, vector<16x128xf32> -> vector<16x128xf32>
    %83 = vector.broadcast %3 : vector<1x128xf32> to vector<16x128xf32>
    %84 = arith.addf %82, %83 : vector<16x128xf32>
    %c0_51 = arith.constant 0 : index
    %c0_52 = arith.constant 0 : index
    %85 = vector.load %arg8[%c0_51, %c0_52] : memref<32x128xf32, #tpu.memory_space<vmem>>, vector<16x128xf32>
    tpu.vector_store %arg8[%c0_51, %c0_52], %84 {strides = array<i32>} : memref<32x128xf32, #tpu.memory_space<vmem>>, vector<16x128xf32>,
    %cst_53 = arith.constant dense<0.000000e+00> : vector<16x128xf32>
    %86 = tpu.matmul %81, %2, %cst_53 {dimension_numbers = #tpu.dot_dimension_numbers<[1], [0], [0], [1], [0, 0, 1, 1], [], []>} : vector<16x256xbf16>, vector<256x128xbf16>, vector<16x128xf32> -> vector<16x128xf32>
    %87 = vector.broadcast %3 : vector<1x128xf32> to vector<16x128xf32>
    %88 = arith.addf %86, %87 : vector<16x128xf32>
    %c16_54 = arith.constant 16 : index
    %c0_55 = arith.constant 0 : index
    %89 = vector.load %arg8[%c16_54, %c0_55] : memref<32x128xf32, #tpu.memory_space<vmem>>, vector<16x128xf32>
    tpu.vector_store %arg8[%c16_54, %c0_55], %88 {strides = array<i32>} : memref<32x128xf32, #tpu.memory_space<vmem>>, vector<16x128xf32>,
    return
  }
  func.func @transform_0(%arg0: i32) -> (i32, i32) {
    %c0_i32 = arith.constant 0 : i32
    %c0_i32_0 = arith.constant 0 : i32
    return %arg0, %c0_i32 : i32, i32
  }
  func.func @transform_1(%arg0: i32) -> (i32, i32) {
    %c0_i32 = arith.constant 0 : i32
    %c0_i32_0 = arith.constant 0 : i32
    %c0_i32_1 = arith.constant 0 : i32
    return %c0_i32, %c0_i32_0 : i32, i32
  }
  func.func @transform_2(%arg0: i32) -> (i32, i32) {
    %c0_i32 = arith.constant 0 : i32
    %c0_i32_0 = arith.constant 0 : i32
    %c0_i32_1 = arith.constant 0 : i32
    return %c0_i32, %c0_i32_0 : i32, i32
  }
  func.func @transform_3(%arg0: i32) -> (i32, i32, i32) {
    %c0_i32 = arith.constant 0 : i32
    %c0_i32_0 = arith.constant 0 : i32
    %c0_i32_1 = arith.constant 0 : i32
    %c0_i32_2 = arith.constant 0 : i32
    return %c0_i32, %c0_i32_0, %c0_i32_1 : i32, i32, i32
  }
  func.func @transform_4(%arg0: i32) -> (i32, i32, i32) {
    %c0_i32 = arith.constant 0 : i32
    %c0_i32_0 = arith.constant 0 : i32
    %c0_i32_1 = arith.constant 0 : i32
    %c0_i32_2 = arith.constant 0 : i32
    return %c0_i32, %c0_i32_0, %c0_i32_1 : i32, i32, i32
  }
  func.func @transform_5(%arg0: i32) -> (i32, i32) {
    %c0_i32 = arith.constant 0 : i32
    %c0_i32_0 = arith.constant 0 : i32
    %c0_i32_1 = arith.constant 0 : i32
    return %c0_i32, %c0_i32_0 : i32, i32
  }
  func.func @transform_6(%arg0: i32) -> (i32, i32) {
    %c0_i32 = arith.constant 0 : i32
    %c0_i32_0 = arith.constant 0 : i32
    %c0_i32_1 = arith.constant 0 : i32
    return %c0_i32, %c0_i32_0 : i32, i32
  }
  func.func @transform_7(%arg0: i32) -> (i32, i32) {
    %c0_i32 = arith.constant 0 : i32
    %c0_i32_0 = arith.constant 0 : i32
    return %arg0, %c0_i32 : i32, i32
  }
}

</mosaic_0001>

<bundles_post_ra>
// kernel: tpu_custom_call.1
= control target key start
LH: loop header
LB: loop body
LE: loop exit
PB: predicated region body
PF: predicated region fallthrough
CT: control target
= control target key end

     0   :  { %12 = vsyncpa [#allocation3], 0  ;;  %s2895_s0 = inlined_call_operand.vmem [shape: bf16[64,32], index: 0, kind: input, shape index: {}]   ;;  %s2896_s1 = inlined_call_operand.vmem [shape: bf16[32,256], index: 1, kind: input, shape index: {}]   ;;  %s2897_s2 = inlined_call_operand.vmem [shape: f32[1,256], index: 2, kind: input, shape index: {}]   ;;  %s2898_s3 = inlined_call_operand.hbm [shape: bf16[4,256,256], index: 3, kind: input, shape index: {}]   ;;  %s2899_s4 = inlined_call_operand.vmem [shape: f32[4,1,256], index: 4, kind: input, shape index: {}]   ;;  %s2900_s5 = inlined_call_operand.hbm [shape: bf16[256,128], index: 5, kind: input, shape index: {}]   ;;  %s2901_s6 = inlined_call_operand.vmem [shape: f32[1,128], index: 6, kind: input, shape index: {}]   ;;  %s2902_s7 = inlined_call_operand.hbm [shape: f32[64,128], index: 7, kind: output, shape index: {}]  }
   0x1   :  { %13 = vsyncpa [#allocation6], 0 }
   0x2   :  { %14 = vsyncpa [#allocation4], 0 }
   0x3   :  { %16 = vsyncpa [#allocation4 + $0x1], 0  ;;  %s2677_s24 = smov 0   ;;  %s2679_s25 = smov 0  }
   0x4   :  { %s2681_s26 = smov 0   ;;  %s2683_s27 = smov 0  }
   0x5 LB: > { %s2698_s28 = sadd.s32 4294967295, %s2625_s27   ;;  %s1999_s29 = sadd.s32 4294967294, %s2625_s27   ;;  %s2625_s27 = sphi %s2683_s27, %s2922_s27   ;;  %s2621_s26 = sphi %s2681_s26, %s2921_s26   ;;  %s2617_s25 = sphi %s2679_s25, %s2920_s25   ;;  %s2613_s24 = sphi %s2677_s24, %s2919_s24  }
   0x6   : > { %s2702_s30 = sadd.s32 1, %s2625_s27   ;;  %s181_s8 = sadd.s32 1, %s2621_s26 }
   0x7   : > { %s178_s9 = ssub.s32 %s2625_s27, %s2702_s30  ;;  %p191_p0 = scmp.ne.s32.totalorder %s2621_s26, %s2617_s25 }
   0x8   : > { %p179_p1 = scmp.eq.s32.totalorder %s178_s9, 0  ;;  %p192_p2 = scmp.eq.s32.totalorder %s2698_s28, 1 }
   0x9   : > { %p197_p3 = scmp.ne.s32.totalorder %s2617_s25, %s2613_s24  ;;  %p198_p4 = scmp.eq.s32.totalorder %s1999_s29, 1 }
   0xa   : > { %s2713_s10 = scalar_select %p179_p1, %s2621_s26, %s181_s8  }
   0xb   : > { %p2715_p5 = por %p192_p2, %p191_p0  ;;  %p2719_p6 = por %p198_p4, %p197_p3 }
   0xc   : > { %2906 = sst [smem:[#allocation11_spill]] %s2713_s10  ;;  %p2000_p7 = scmp.ge.s32.totalorder %s2625_s27, 1 }
   0xd   : > { %s2907_s11 = scalar_select %p2715_p5, 1, 0 }
   0xe   : > { %s2908_s12 = scalar_select %p2719_p6, 1, 0 }
   0xf   : > { %p205_p8 = scmp.lt.s32.totalorder %s2625_s27, 3  ;;  %p2903_p9 = scmp.eq.s32.totalorder %s2698_s28, 0 }
  0x10   : > { %s2627_s14 = smov [#allocation2]   ;;  %s2628_s17 = smov [#allocation5]  }
  0x11   : > { %p2726_p10 = pnand %p2000_p7, %p205_p8  ;;  %s223_s15 = sshll.u32 %s2627_s14, 4  ;;  %s224_s15 = int_to_ptr.vmem [resolvable:$true] %s223_s15 }
  0x12   : > { %s239_s18 = sshll.u32 %s2628_s17, 4  ;;  %s2499_s21 = scalar_lea.hbm %s2898_s3, 16384  ;;  %s2738_s18 = int_to_ptr.vmem [resolvable:$true] %s239_s18 }
  0x13   : > { %s2909_s13 = scalar_select %p2726_p10, 1, 0 }
  0x14   : > { %p2226_p11 = pneg %p2726_p10  ;;  %p2500_p13 = scmp.ne.s32.totalorder %s2898_s3, %s2499_s21 }
  0x15   : > { %p2506_p3 = scmp.lt.u32.totalorder %s2499_s21, %s2898_s3 }
  0x16   : > { %p2734_p12 = pnand %p2903_p9, %p2226_p11 }
  0x18   : > { %p2501_p0 = pneg %p2734_p12 }
  0x1a   : > { %p2502_p1 = pnand %p2501_p0, %p2500_p13 }
  0x1c   : > { %p2503_p2 = pneg %p2502_p1 }
  0x1e   : > { %p2508_p4 = pnand %p2506_p3, %p2503_p2 }
  0x20   : > { %2511 = shalt.err (!%p2508_p4)
}
  0x21   : > { %s2512_s9 = scalar_lea.vmem %s224_s15, 16384  ;;  %p2520_p9 = scmp.lt.s32.totalorder %s224_s15, %s224_s15 }
  0x22   : > { %p2513_p7 = scmp.ne.s32.totalorder %s224_s15, %s2512_s9  ;;  %p2521_p6 = scmp.lt.s32.totalorder %s2512_s9, %s2512_s9 }
  0x24   : > { %p2515_p8 = pnand %p2513_p7, %p2501_p0  ;;  %p2522_p5 = por %p2521_p6, %p2520_p9 }
  0x26   : > { %p2516_p11 = pneg %p2515_p8 }
  0x28   : > { %p2523_p10 = pnand %p2522_p5, %p2516_p11 }
  0x2a   : > { %2526 = shalt.err (!%p2523_p10)
}
  0x2b   : > { %s2629_s14 = smov 128   ;;  %s2630_s17 = smov 8  }
  0x2c   : > { %2229 = dma.hbm_to_vmem [thread:$0]  (!%p2734_p12), %s2898_s3, 16384, %s224_s15, [#allocation3], %s2629_s14, %s2629_s14, %s2630_s17  }
  0x2d   : > { %s2527_s23 = scalar_lea.hbm %s2900_s5, 2048 }
  0x2e   : > { %p2528_p13 = scmp.ne.s32.totalorder %s2900_s5, %s2527_s23  ;;  %p2534_p9 = scmp.lt.u32.totalorder %s2527_s23, %s2900_s5 }
  0x30   : > { %p2530_p5 = pnand %p2528_p13, %p2501_p0 }
  0x32   : > { %p2531_p6 = pneg %p2530_p5 }
  0x34   : > { %p2536_p10 = pnand %p2534_p9, %p2531_p6 }
  0x36   : > { %2539 = shalt.err (!%p2536_p10)
}
  0x37   : > { %s2540_s15 = scalar_lea.vmem %s2738_s18, 2048  ;;  %p2548_p4 = scmp.lt.s32.totalorder %s2738_s18, %s2738_s18 }
  0x38   : > { %p2541_p1 = scmp.ne.s32.totalorder %s2738_s18, %s2540_s15  ;;  %p2549_p7 = scmp.lt.s32.totalorder %s2540_s15, %s2540_s15 }
  0x3a   : > { %p2543_p2 = pnand %p2541_p1, %p2501_p0  ;;  %p2550_p8 = por %p2549_p7, %p2548_p4 }
  0x3c   : > { %p2544_p3 = pneg %p2543_p2 }
  0x3e   : > { %p2551_p11 = pnand %p2550_p8, %p2544_p3 }
  0x40   : > { %2554 = shalt.err (!%p2551_p11)
}
  0x41   : > { %s2631_s10 = smov 64   ;;  %s2632_s14 = smov 4  }
  0x42   : > { %2232 = dma.hbm_to_vmem [thread:$0]  (!%p2734_p12), %s2900_s5, 2048, %s2738_s18, [#allocation6], %s2631_s10, %s2631_s10, %s2632_s14  }
  0x43   : > { %p2911_p13 = scmp.ne.s32.totalorder %s2909_s13, 0 }
  0x44   : > { %p2912_p0 = scmp.eq.s32.totalorder (!%p2911_p13), %s2698_s28, 0 }
  0x45   : > { %267 = sbr.rel (%p2911_p13) target bundleno = 1434 (0x59a), region = 48 }
  0x4c   : > { %2600 = dma.done.wait (%p2912_p0), [#allocation3], 16384   ;;  %p2913_p5 = pmov %p2912_p0 }
  0x4d   : > { %p2914_p6 = pmov %p2912_p0 }
  0x4e   : > { %2602 = vsyncadd (%p2913_p5), [#allocation3], 4294950912 }
  0x4f   : > { %2604 = dma.done.wait (%p2914_p6), [#allocation6], 2048   ;;  %p2915_p9 = pmov %p2912_p0 }
  0x50   : > { %s2008_s16 = sshll.u32 %s2698_s28, 2  ;;  %v2633_v0 = vmov 0   ;;  %v2283_v1 = vld [vmem:[%s2896_s1 + $0x4] ss:$8 sps:$4 sm:$0xff]   ;;  %v2285_v2 = vld [vmem:[%s2896_s1] ss:$8 sps:$4 sm:$0xff]   ;;  %v352_v40 = vlaneseq }
  0x51   : > { %2606 = vsyncadd (%p2915_p9), [#allocation6], 4294965248  ;;  %423 = vmatprep.mubr.bf16.mxu0 %v2633_v0  ;;  %482 = vmatprep.mubr.bf16.mxu1 %v2633_v0  ;;  %p304_p12 = scmp.lt.s32.totalorder %s2008_s16, 7  ;;  %v2286_v3 = vld [vmem:[%s2896_s1 + $0x14] ss:$8 sps:$4 sm:$0xff]   ;;  %vm387_vm0 = vcmask 261120  }
  0x52   : > { %391 = vmatprep.subr.bf16.mxu0 %v2283_v1  ;;  %450 = vmatprep.subr.bf16.mxu1 %v2283_v1  ;;  %v2288_v4 = vld [vmem:[%s2896_s1 + $0x10] ss:$8 sps:$4 sm:$0xff]   ;;  %v2293_v6 = vld [vmem:[#allocation2 + $0x4] ss:$8 sps:$4 sm:$0xff]   ;;  %v2291_v8 = vld [vmem:[#allocation2] ss:$8 sps:$4 sm:$0xff]  }
  0x53   : > { %s2924_s16 = smov (!%p304_p12, %s2008_s16), 7  ;;  %392 = vmatpush1.bf16.msra.mxu0 %v2285_v2  ;;  %451 = vmatpush1.bf16.msra.mxu1 %v2285_v2  ;;  %v2296_v9 = vld [vmem:[#allocation2 + $0x14] ss:$8 sps:$4 sm:$0xff]   ;;  %v2294_v10 = vld [vmem:[#allocation2 + $0x10] ss:$8 sps:$4 sm:$0xff]   ;;  %v353_v41 = vshrl.u32 %v352_v40, 7 }
  0x54   : > { %s2009_s13 = sshll.u32 %s2924_s16, 2  ;;  %393 = vmatprep.subr.bf16.mxu0 %v2286_v3  ;;  %452 = vmatprep.subr.bf16.mxu1 %v2286_v3  ;;  %v2299_v11 = vld [vmem:[#allocation2 + $0x24] ss:$8 sps:$4 sm:$0xff]   ;;  %v2297_v12 = vld [vmem:[#allocation2 + $0x20] ss:$8 sps:$4 sm:$0xff]   ;;  %s2171_s19 = sshll.u32 %s2698_s28, 9 }
  0x55   : > { %s307_s8 = scalar_lea.vmem %s2895_s0, %s2009_s13  ;;  %v2302_v13 = vld [vmem:[#allocation2 + $0x34] ss:$8 sps:$4 sm:$0xff]   ;;  %v2300_v14 = vld [vmem:[#allocation2 + $0x30] ss:$8 sps:$4 sm:$0xff]   ;;  %v2305_v15 = vld [vmem:[#allocation2 + $0x44] ss:$8 sps:$4 sm:$0xff]   ;;  %s2852_s18 = scalar_lea.hbm %s2902_s7, %s2171_s19 }
  0x56   : > { %v2289_v5 = vld [vmem:[%s307_s8] sm:$0xff]   ;;  %v2290_v7 = vld [vmem:[%s307_s8 + $0x8] sm:$0xff]   ;;  %v2308_v17 = vld [vmem:[#allocation2 + $0x54] ss:$8 sps:$4 sm:$0xff]   ;;  %v2813_v42 = vsub.s32 0, %v353_v41  ;;  %v2818_v44 = vsub.s32 1, %v353_v41 }
  0x57   : > { %394 = vmatpush1.bf16.msra.mxu0 %v2288_v4  ;;  %453 = vmatpush1.bf16.msra.mxu1 %v2288_v4  ;;  %v2303_v16 = vld [vmem:[#allocation2 + $0x40] ss:$8 sps:$4 sm:$0xff]   ;;  %v2306_v18 = vld [vmem:[#allocation2 + $0x50] ss:$8 sps:$4 sm:$0xff]   ;;  %v2311_v19 = vld [vmem:[#allocation2 + $0x64] ss:$8 sps:$4 sm:$0xff]  }
  0x58   : > { %703 = vmatprep.subr.bf16.mxu0 %v2293_v6  ;;  %752 = vmatprep.subr.bf16.mxu1 %v2293_v6  ;;  %v2309_v20 = vld [vmem:[#allocation2 + $0x60] ss:$8 sps:$4 sm:$0xff]   ;;  %v2314_v21 = vld [vmem:[#allocation2 + $0x74] ss:$8 sps:$4 sm:$0xff]   ;;  %v2312_v22 = vld [vmem:[#allocation2 + $0x70] ss:$8 sps:$4 sm:$0xff]  }
  0x59   : > { %v2317_v23 = vld [vmem:[#allocation2 + $0x84] ss:$8 sps:$4 sm:$0xff]   ;;  %v2315_v24 = vld [vmem:[#allocation2 + $0x80] ss:$8 sps:$4 sm:$0xff]   ;;  %v2320_v25 = vld [vmem:[#allocation2 + $0x94] ss:$8 sps:$4 sm:$0xff]  }
  0x5a   : > { %2015 = vmatmul.mubr.msk.bf16.vlgmr.msra.gmra.mrb[0].mxu0 %vm387_vm0, %v2289_v5  ;;  %2017 = vmatmul.mubr.msk.bf16.vlgmr.msra.gmra.mrb[0].mxu1 %vm387_vm0, %v2290_v7  ;;  %v2318_v26 = vld [vmem:[#allocation2 + $0x90] ss:$8 sps:$4 sm:$0xff]   ;;  %v2323_v27 = vld [vmem:[#allocation2 + $0xa4] ss:$8 sps:$4 sm:$0xff]   ;;  %v2321_v28 = vld [vmem:[#allocation2 + $0xa0] ss:$8 sps:$4 sm:$0xff]  }
  0x5b   : > { %704 = vmatpush1.bf16.msra.mxu0 %v2291_v8  ;;  %753 = vmatpush1.bf16.msra.mxu1 %v2291_v8  ;;  %v2326_v29 = vld [vmem:[#allocation2 + $0xb4] ss:$8 sps:$4 sm:$0xff]   ;;  %v2324_v30 = vld [vmem:[#allocation2 + $0xb0] ss:$8 sps:$4 sm:$0xff]   ;;  %v2329_v31 = vld [vmem:[#allocation2 + $0xc4] ss:$8 sps:$4 sm:$0xff]  }
  0x5c   : > { %705 = vmatprep.subr.bf16.mxu0 %v2296_v9  ;;  %754 = vmatprep.subr.bf16.mxu1 %v2296_v9  ;;  %v2327_v32 = vld [vmem:[#allocation2 + $0xc0] ss:$8 sps:$4 sm:$0xff]   ;;  %v2332_v33 = vld [vmem:[#allocation2 + $0xd4] ss:$8 sps:$4 sm:$0xff]   ;;  %v2330_v34 = vld [vmem:[#allocation2 + $0xd0] ss:$8 sps:$4 sm:$0xff]  }
  0x5d   : > { %v2335_v35 = vld [vmem:[#allocation2 + $0xe4] ss:$8 sps:$4 sm:$0xff]   ;;  %v2333_v36 = vld [vmem:[#allocation2 + $0xe0] ss:$8 sps:$4 sm:$0xff]   ;;  %v2338_v37 = vld [vmem:[#allocation2 + $0xf4] ss:$8 sps:$4 sm:$0xff]  }
  0x5e   : > { %v2336_v38 = vld [vmem:[#allocation2 + $0xf0] ss:$8 sps:$4 sm:$0xff]   ;;  %v2341_v39 = vld [vmem:[#allocation2 + $0x104] ss:$8 sps:$4 sm:$0xff]   ;;  %v315_v43 = vld [vmem:[%s2897_s2] sm:$0x3] }
  0x5f   : > { %706 = vmatpush1.bf16.msra.mxu0 %v2294_v10  ;;  %755 = vmatpush1.bf16.msra.mxu1 %v2294_v10  ;;  %v355_v45 = vrot.slane %v315_v43, %v2813_v42  ;;  %v359_v46 = vrot.slane %v315_v43, %v2818_v44  ;;  %v2386_v40 = vld [vmem:[#allocation2 + $0x1f4] ss:$8 sps:$4 sm:$0xff]   ;;  %v2384_v41 = vld [vmem:[#allocation2 + $0x1f0] ss:$8 sps:$4 sm:$0xff]   ;;  %v2389_v43 = vld [vmem:[#allocation2 + $0x204] ss:$8 sps:$4 sm:$0xff]  }
  0x60   : > { %707 = vmatprep.subr.bf16.mxu0 %v2299_v11  ;;  %756 = vmatprep.subr.bf16.mxu1 %v2299_v11  ;;  %v2339_v11 = vld [vmem:[#allocation2 + $0x100] ss:$8 sps:$4 sm:$0xff]   ;;  %s300_s8 = sand.u32 1, %s2617_s25   ;;  %p2916_p1 = scmp.ne.s32.totalorder %s2907_s11, 0 }
  0x61   : > { %s2007_s9 = sshll.u32 %s300_s8, 5  ;;  %s2854_s28 = scalar_lea.sflag [#allocation4], %s300_s8 }
  0x62   : > { %s302_s14 = scalar_lea.vmem [#allocation7], %s2007_s9  ;;  %s2634_s21 = smov [#allocation7]  }
  0x63   : > { %708 = vmatpush1.bf16.msra.mxu0 %v2297_v12  ;;  %757 = vmatpush1.bf16.msra.mxu1 %v2297_v12  ;;  %v2344_v12 = vld [vmem:[#allocation2 + $0x114] ss:$8 sps:$4 sm:$0xff]   ;;  %s1915_s17 = sshll.u32 %s302_s14, 4  ;;  %s2559_s22 = sshll.u32 %s2634_s21, 4  ;;  %s2847_s17 = int_to_ptr.vmem [resolvable:$true] %s1915_s17  ;;  %s2560_s22 = int_to_ptr.vmem [resolvable:$false] %s2559_s22 }
  0x64   : > { %709 = vmatprep.subr.bf16.mxu0 %v2302_v13  ;;  %758 = vmatprep.subr.bf16.mxu1 %v2302_v13  ;;  %v2342_v13 = vld [vmem:[#allocation2 + $0x110] ss:$8 sps:$4 sm:$0xff]   ;;  %s2555_s20 = scalar_lea.vmem %s2847_s17, 512  ;;  %s2561_s23 = scalar_lea.vmem %s2560_s22, 1024 }
  0x65   : > { %p2556_p10 = scmp.ne.s32.totalorder %s2847_s17, %s2555_s20  ;;  %p2562_p4 = scmp.lt.s32.totalorder %s2847_s17, %s2560_s22 }
  0x66   : > { %p2563_p7 = scmp.lt.s32.totalorder %s2561_s23, %s2555_s20 }
  0x67   : > { %710 = vmatpush1.bf16.msra.mxu0 %v2300_v14  ;;  %759 = vmatpush1.bf16.msra.mxu1 %v2300_v14  ;;  %v2347_v14 = vld [vmem:[#allocation2 + $0x124] ss:$8 sps:$4 sm:$0xff]   ;;  %p2557_p2 = pnand %p2556_p10, %p2916_p1 }
  0x68   : > { %711 = vmatprep.subr.bf16.mxu0 %v2305_v15  ;;  %760 = vmatprep.subr.bf16.mxu1 %v2305_v15  ;;  %v2345_v15 = vld [vmem:[#allocation2 + $0x120] ss:$8 sps:$4 sm:$0xff]   ;;  %p2564_p8 = por %p2563_p7, %p2562_p4 }
  0x69   : > { %p2558_p3 = pneg %p2557_p2 }
  0x6b   : > { %712 = vmatpush1.bf16.msra.mxu0 %v2303_v16  ;;  %761 = vmatpush1.bf16.msra.mxu1 %v2303_v16  ;;  %v2350_v16 = vld [vmem:[#allocation2 + $0x134] ss:$8 sps:$4 sm:$0xff]   ;;  %p2565_p11 = pnand %p2564_p8, %p2558_p3 }
  0x6c   : > { %713 = vmatprep.subr.bf16.mxu0 %v2308_v17  ;;  %762 = vmatprep.subr.bf16.mxu1 %v2308_v17  ;;  %v2348_v17 = vld [vmem:[#allocation2 + $0x130] ss:$8 sps:$4 sm:$0xff]  }
  0x6f   : > { %714 = vmatpush1.bf16.msra.mxu0 %v2306_v18  ;;  %763 = vmatpush1.bf16.msra.mxu1 %v2306_v18  ;;  %v2353_v18 = vld [vmem:[#allocation2 + $0x144] ss:$8 sps:$4 sm:$0xff]  }
  0x70   : > { %715 = vmatprep.subr.bf16.mxu0 %v2311_v19  ;;  %764 = vmatprep.subr.bf16.mxu1 %v2311_v19  ;;  %v2351_v19 = vld [vmem:[#allocation2 + $0x140] ss:$8 sps:$4 sm:$0xff]  }
  0x73   : > { %716 = vmatpush1.bf16.msra.mxu0 %v2309_v20  ;;  %765 = vmatpush1.bf16.msra.mxu1 %v2309_v20  ;;  %v2356_v20 = vld [vmem:[#allocation2 + $0x154] ss:$8 sps:$4 sm:$0xff]  }
  0x74   : > { %717 = vmatprep.subr.bf16.mxu0 %v2314_v21  ;;  %766 = vmatprep.subr.bf16.mxu1 %v2314_v21  ;;  %v2354_v21 = vld [vmem:[#allocation2 + $0x150] ss:$8 sps:$4 sm:$0xff]  }
  0x77   : > { %718 = vmatpush1.bf16.msra.mxu0 %v2312_v22  ;;  %767 = vmatpush1.bf16.msra.mxu1 %v2312_v22  ;;  %v2359_v22 = vld [vmem:[#allocation2 + $0x164] ss:$8 sps:$4 sm:$0xff]  }
  0x78   : > { %719 = vmatprep.subr.bf16.mxu0 %v2317_v23  ;;  %768 = vmatprep.subr.bf16.mxu1 %v2317_v23  ;;  %v2357_v23 = vld [vmem:[#allocation2 + $0x160] ss:$8 sps:$4 sm:$0xff]  }
  0x7b   : > { %720 = vmatpush1.bf16.msra.mxu0 %v2315_v24  ;;  %769 = vmatpush1.bf16.msra.mxu1 %v2315_v24  ;;  %v2362_v24 = vld [vmem:[#allocation2 + $0x174] ss:$8 sps:$4 sm:$0xff]  }
  0x7c   : > { %721 = vmatprep.subr.bf16.mxu0 %v2320_v25  ;;  %770 = vmatprep.subr.bf16.mxu1 %v2320_v25  ;;  %v2360_v25 = vld [vmem:[#allocation2 + $0x170] ss:$8 sps:$4 sm:$0xff]  }
  0x7f   : > { %722 = vmatpush1.bf16.msra.mxu0 %v2318_v26  ;;  %771 = vmatpush1.bf16.msra.mxu1 %v2318_v26  ;;  %v2365_v26 = vld [vmem:[#allocation2 + $0x184] ss:$8 sps:$4 sm:$0xff]  }
  0x80   : > { %723 = vmatprep.subr.bf16.mxu0 %v2323_v27  ;;  %772 = vmatprep.subr.bf16.mxu1 %v2323_v27  ;;  %v2363_v27 = vld [vmem:[#allocation2 + $0x180] ss:$8 sps:$4 sm:$0xff]  }
  0x83   : > { %724 = vmatpush1.bf16.msra.mxu0 %v2321_v28  ;;  %773 = vmatpush1.bf16.msra.mxu1 %v2321_v28  ;;  %v2368_v28 = vld [vmem:[#allocation2 + $0x194] ss:$8 sps:$4 sm:$0xff]  }
  0x84   : > { %725 = vmatprep.subr.bf16.mxu0 %v2326_v29  ;;  %774 = vmatprep.subr.bf16.mxu1 %v2326_v29  ;;  %v2366_v29 = vld [vmem:[#allocation2 + $0x190] ss:$8 sps:$4 sm:$0xff]  }
  0x87   : > { %726 = vmatpush1.bf16.msra.mxu0 %v2324_v30  ;;  %775 = vmatpush1.bf16.msra.mxu1 %v2324_v30  ;;  %v2371_v30 = vld [vmem:[#allocation2 + $0x1a4] ss:$8 sps:$4 sm:$0xff]  }
  0x88   : > { %727 = vmatprep.subr.bf16.mxu0 %v2329_v31  ;;  %776 = vmatprep.subr.bf16.mxu1 %v2329_v31  ;;  %v2369_v31 = vld [vmem:[#allocation2 + $0x1a0] ss:$8 sps:$4 sm:$0xff]  }
  0x8b   : > { %728 = vmatpush1.bf16.msra.mxu0 %v2327_v32  ;;  %777 = vmatpush1.bf16.msra.mxu1 %v2327_v32  ;;  %v2374_v32 = vld [vmem:[#allocation2 + $0x1b4] ss:$8 sps:$4 sm:$0xff]  }
  0x8c   : > { %729 = vmatprep.subr.bf16.mxu0 %v2332_v33  ;;  %778 = vmatprep.subr.bf16.mxu1 %v2332_v33  ;;  %v2372_v33 = vld [vmem:[#allocation2 + $0x1b0] ss:$8 sps:$4 sm:$0xff]  }
  0x8f   : > { %730 = vmatpush1.bf16.msra.mxu0 %v2330_v34  ;;  %779 = vmatpush1.bf16.msra.mxu1 %v2330_v34  ;;  %v2377_v34 = vld [vmem:[#allocation2 + $0x1c4] ss:$8 sps:$4 sm:$0xff]  }
  0x90   : > { %731 = vmatprep.subr.bf16.mxu0 %v2335_v35  ;;  %780 = vmatprep.subr.bf16.mxu1 %v2335_v35  ;;  %v2375_v35 = vld [vmem:[#allocation2 + $0x1c0] ss:$8 sps:$4 sm:$0xff]  }
  0x93   : > { %732 = vmatpush1.bf16.msra.mxu0 %v2333_v36  ;;  %781 = vmatpush1.bf16.msra.mxu1 %v2333_v36  ;;  %v2380_v36 = vld [vmem:[#allocation2 + $0x1d4] ss:$8 sps:$4 sm:$0xff]  }
  0x94   : > { %733 = vmatprep.subr.bf16.mxu0 %v2338_v37  ;;  %782 = vmatprep.subr.bf16.mxu1 %v2338_v37  ;;  %v2378_v37 = vld [vmem:[#allocation2 + $0x1d0] ss:$8 sps:$4 sm:$0xff]  }
  0x97   : > { %734 = vmatpush1.bf16.msra.mxu0 %v2336_v38  ;;  %783 = vmatpush1.bf16.msra.mxu1 %v2336_v38  ;;  %v2383_v38 = vld [vmem:[#allocation2 + $0x1e4] ss:$8 sps:$4 sm:$0xff]  }
  0x98   : > { %1007 = vmatprep.subr.bf16.mxu0 %v2341_v39  ;;  %1056 = vmatprep.subr.bf16.mxu1 %v2341_v39  ;;  %v2381_v39 = vld [vmem:[#allocation2 + $0x1e0] ss:$8 sps:$4 sm:$0xff]  }
 0x12d   : > { %v425_v47 = vpop.f32.mrb[0].mxu0  ;;  %v484_v48 = vpop.f32.mrb[0].mxu1 }
 0x12e   : > { %v426_v49 = vadd.f32 %v425_v47, %v355_v45  ;;  %v485_v50 = vadd.f32 %v484_v48, %v355_v45  ;;  %v427_v51 = vpop.f32.mrb[1].mxu0  ;;  %v486_v52 = vpop.f32.mrb[1].mxu1 }
 0x12f   : > { %v428_v53 = vadd.f32 %v427_v51, %v359_v46  ;;  %v487_v54 = vadd.f32 %v486_v52, %v359_v46  ;;  %v429_v55 = vpop.f32.mrb[2].mxu0  ;;  %v488_v56 = vpop.f32.mrb[2].mxu1 }
 0x130   : > { %v430_v57 = vadd.f32 %v429_v55, %v355_v45  ;;  %v489_v58 = vadd.f32 %v488_v56, %v355_v45  ;;  %v431_v59 = vpop.f32.mrb[3].mxu0  ;;  %v490_v60 = vpop.f32.mrb[3].mxu1  ;;  %v434_v63 = vmax.f32 %v426_v49, 0.0  ;;  %v493_v0 = vmax.f32 %v485_v50, 0.0  ;;  %v531_v45 = vld [vmem:[%s2899_s4] sm:$0x3] }
 0x131   : > { %v432_v61 = vadd.f32 %v431_v59, %v359_v46  ;;  %v491_v62 = vadd.f32 %v490_v60, %v359_v46  ;;  %v435_v3 = vmax.f32 %v428_v53, 0.0  ;;  %v494_v4 = vmax.f32 %v487_v54, 0.0 }
 0x132   : > { %v436_v1 = vmax.f32 %v430_v57, 0.0  ;;  %v495_v2 = vmax.f32 %v489_v58, 0.0  ;;  %v536_v46 = vrot.slane %v531_v45, %v2813_v42  ;;  %v540_v47 = vrot.slane %v531_v45, %v2818_v44  ;;  %v2437_v45 = vld [vmem:[#allocation2 + $0x304] ss:$8 sps:$4 sm:$0xff]  }
 0x133   : > { %v437_v5 = vmax.f32 %v432_v61, 0.0  ;;  %v496_v6 = vmax.f32 %v491_v62, 0.0 }
 0x134   : > { %v438_v7 = vpack.c.bf16 %v436_v1, %v434_v63  ;;  %v497_v8 = vpack.c.bf16 %v495_v2, %v493_v0 }
 0x135   : > { %v439_v9 = vpack.c.bf16 %v437_v5, %v435_v3  ;;  %v498_v10 = vpack.c.bf16 %v496_v6, %v494_v4 }
 0x137   : > { %735 = vmatprep.mubr.bf16.mxu0 %v439_v9  ;;  %784 = vmatprep.mubr.bf16.mxu1 %v498_v10 }
 0x138   : > { %736 = vmatmul.mubr.bf16.vlgmr.msra.gmra.mrb[4].mxu0 %v438_v7  ;;  %785 = vmatmul.mubr.bf16.vlgmr.msra.gmra.mrb[4].mxu1 %v497_v8 }
 0x139   : > { %1008 = vmatpush1.bf16.msra.mxu0 %v2339_v11  ;;  %1057 = vmatpush1.bf16.msra.mxu1 %v2339_v11 }
 0x13a   : > { %1009 = vmatprep.subr.bf16.mxu0 %v2344_v12  ;;  %1058 = vmatprep.subr.bf16.mxu1 %v2344_v12  ;;  %v2387_v12 = vld [vmem:[#allocation2 + $0x200] ss:$8 sps:$4 sm:$0xff]  }
 0x13d   : > { %1010 = vmatpush1.bf16.msra.mxu0 %v2342_v13  ;;  %1059 = vmatpush1.bf16.msra.mxu1 %v2342_v13  ;;  %v2392_v13 = vld [vmem:[#allocation2 + $0x214] ss:$8 sps:$4 sm:$0xff]  }
 0x13e   : > { %1011 = vmatprep.subr.bf16.mxu0 %v2347_v14  ;;  %1060 = vmatprep.subr.bf16.mxu1 %v2347_v14  ;;  %v2390_v14 = vld [vmem:[#allocation2 + $0x210] ss:$8 sps:$4 sm:$0xff]  }
 0x141   : > { %1012 = vmatpush1.bf16.msra.mxu0 %v2345_v15  ;;  %1061 = vmatpush1.bf16.msra.mxu1 %v2345_v15  ;;  %v2395_v15 = vld [vmem:[#allocation2 + $0x224] ss:$8 sps:$4 sm:$0xff]  }
 0x142   : > { %1013 = vmatprep.subr.bf16.mxu0 %v2350_v16  ;;  %1062 = vmatprep.subr.bf16.mxu1 %v2350_v16  ;;  %v2393_v16 = vld [vmem:[#allocation2 + $0x220] ss:$8 sps:$4 sm:$0xff]  }
 0x145   : > { %1014 = vmatpush1.bf16.msra.mxu0 %v2348_v17  ;;  %1063 = vmatpush1.bf16.msra.mxu1 %v2348_v17  ;;  %v2398_v17 = vld [vmem:[#allocation2 + $0x234] ss:$8 sps:$4 sm:$0xff]  }
 0x146   : > { %1015 = vmatprep.subr.bf16.mxu0 %v2353_v18  ;;  %1064 = vmatprep.subr.bf16.mxu1 %v2353_v18  ;;  %v2396_v18 = vld [vmem:[#allocation2 + $0x230] ss:$8 sps:$4 sm:$0xff]  }
 0x149   : > { %1016 = vmatpush1.bf16.msra.mxu0 %v2351_v19  ;;  %1065 = vmatpush1.bf16.msra.mxu1 %v2351_v19  ;;  %v2401_v19 = vld [vmem:[#allocation2 + $0x244] ss:$8 sps:$4 sm:$0xff]  }
 0x14a   : > { %1017 = vmatprep.subr.bf16.mxu0 %v2356_v20  ;;  %1066 = vmatprep.subr.bf16.mxu1 %v2356_v20  ;;  %v2399_v20 = vld [vmem:[#allocation2 + $0x240] ss:$8 sps:$4 sm:$0xff]  }
 0x14d   : > { %1018 = vmatpush1.bf16.msra.mxu0 %v2354_v21  ;;  %1067 = vmatpush1.bf16.msra.mxu1 %v2354_v21  ;;  %v2404_v21 = vld [vmem:[#allocation2 + $0x254] ss:$8 sps:$4 sm:$0xff]  }
 0x14e   : > { %1019 = vmatprep.subr.bf16.mxu0 %v2359_v22  ;;  %1068 = vmatprep.subr.bf16.mxu1 %v2359_v22  ;;  %v2402_v22 = vld [vmem:[#allocation2 + $0x250] ss:$8 sps:$4 sm:$0xff]  }
 0x151   : > { %1020 = vmatpush1.bf16.msra.mxu0 %v2357_v23  ;;  %1069 = vmatpush1.bf16.msra.mxu1 %v2357_v23  ;;  %v2407_v23 = vld [vmem:[#allocation2 + $0x264] ss:$8 sps:$4 sm:$0xff]  }
 0x152   : > { %1021 = vmatprep.subr.bf16.mxu0 %v2362_v24  ;;  %1070 = vmatprep.subr.bf16.mxu1 %v2362_v24  ;;  %v2405_v24 = vld [vmem:[#allocation2 + $0x260] ss:$8 sps:$4 sm:$0xff]  }
 0x155   : > { %1022 = vmatpush1.bf16.msra.mxu0 %v2360_v25  ;;  %1071 = vmatpush1.bf16.msra.mxu1 %v2360_v25  ;;  %v2410_v25 = vld [vmem:[#allocation2 + $0x274] ss:$8 sps:$4 sm:$0xff]  }
 0x156   : > { %1023 = vmatprep.subr.bf16.mxu0 %v2365_v26  ;;  %1072 = vmatprep.subr.bf16.mxu1 %v2365_v26  ;;  %v2408_v26 = vld [vmem:[#allocation2 + $0x270] ss:$8 sps:$4 sm:$0xff]  }
 0x159   : > { %1024 = vmatpush1.bf16.msra.mxu0 %v2363_v27  ;;  %1073 = vmatpush1.bf16.msra.mxu1 %v2363_v27  ;;  %v2413_v27 = vld [vmem:[#allocation2 + $0x284] ss:$8 sps:$4 sm:$0xff]  }
 0x15a   : > { %1025 = vmatprep.subr.bf16.mxu0 %v2368_v28  ;;  %1074 = vmatprep.subr.bf16.mxu1 %v2368_v28  ;;  %v2411_v28 = vld [vmem:[#allocation2 + $0x280] ss:$8 sps:$4 sm:$0xff]  }
 0x15d   : > { %1026 = vmatpush1.bf16.msra.mxu0 %v2366_v29  ;;  %1075 = vmatpush1.bf16.msra.mxu1 %v2366_v29  ;;  %v2416_v29 = vld [vmem:[#allocation2 + $0x294] ss:$8 sps:$4 sm:$0xff]  }
 0x15e   : > { %1027 = vmatprep.subr.bf16.mxu0 %v2371_v30  ;;  %1076 = vmatprep.subr.bf16.mxu1 %v2371_v30  ;;  %v2414_v30 = vld [vmem:[#allocation2 + $0x290] ss:$8 sps:$4 sm:$0xff]  }
 0x161   : > { %1028 = vmatpush1.bf16.msra.mxu0 %v2369_v31  ;;  %1077 = vmatpush1.bf16.msra.mxu1 %v2369_v31  ;;  %v2419_v31 = vld [vmem:[#allocation2 + $0x2a4] ss:$8 sps:$4 sm:$0xff]  }
 0x162   : > { %1029 = vmatprep.subr.bf16.mxu0 %v2374_v32  ;;  %1078 = vmatprep.subr.bf16.mxu1 %v2374_v32  ;;  %v2417_v32 = vld [vmem:[#allocation2 + $0x2a0] ss:$8 sps:$4 sm:$0xff]  }
 0x165   : > { %1030 = vmatpush1.bf16.msra.mxu0 %v2372_v33  ;;  %1079 = vmatpush1.bf16.msra.mxu1 %v2372_v33  ;;  %v2422_v33 = vld [vmem:[#allocation2 + $0x2b4] ss:$8 sps:$4 sm:$0xff]  }
 0x166   : > { %1031 = vmatprep.subr.bf16.mxu0 %v2377_v34  ;;  %1080 = vmatprep.subr.bf16.mxu1 %v2377_v34  ;;  %v2420_v34 = vld [vmem:[#allocation2 + $0x2b0] ss:$8 sps:$4 sm:$0xff]  }
 0x169   : > { %1032 = vmatpush1.bf16.msra.mxu0 %v2375_v35  ;;  %1081 = vmatpush1.bf16.msra.mxu1 %v2375_v35  ;;  %v2425_v35 = vld [vmem:[#allocation2 + $0x2c4] ss:$8 sps:$4 sm:$0xff]  }
 0x16a   : > { %1033 = vmatprep.subr.bf16.mxu0 %v2380_v36  ;;  %1082 = vmatprep.subr.bf16.mxu1 %v2380_v36  ;;  %v2423_v36 = vld [vmem:[#allocation2 + $0x2c0] ss:$8 sps:$4 sm:$0xff]  }
 0x16d   : > { %1034 = vmatpush1.bf16.msra.mxu0 %v2378_v37  ;;  %1083 = vmatpush1.bf16.msra.mxu1 %v2378_v37  ;;  %v2428_v37 = vld [vmem:[#allocation2 + $0x2d4] ss:$8 sps:$4 sm:$0xff]  }
 0x16e   : > { %1035 = vmatprep.subr.bf16.mxu0 %v2383_v38  ;;  %1084 = vmatprep.subr.bf16.mxu1 %v2383_v38  ;;  %v2426_v38 = vld [vmem:[#allocation2 + $0x2d0] ss:$8 sps:$4 sm:$0xff]  }
 0x171   : > { %1036 = vmatpush1.bf16.msra.mxu0 %v2381_v39  ;;  %1085 = vmatpush1.bf16.msra.mxu1 %v2381_v39  ;;  %v2431_v39 = vld [vmem:[#allocation2 + $0x2e4] ss:$8 sps:$4 sm:$0xff]  }
 0x172   : > { %1037 = vmatprep.subr.bf16.mxu0 %v2386_v40  ;;  %1086 = vmatprep.subr.bf16.mxu1 %v2386_v40  ;;  %v2429_v40 = vld [vmem:[#allocation2 + $0x2e0] ss:$8 sps:$4 sm:$0xff]  }
 0x175   : > { %1038 = vmatpush1.bf16.msra.mxu0 %v2384_v41  ;;  %1087 = vmatpush1.bf16.msra.mxu1 %v2384_v41  ;;  %v2434_v41 = vld [vmem:[#allocation2 + $0x2f4] ss:$8 sps:$4 sm:$0xff]  }
 0x176   : > { %1311 = vmatprep.subr.bf16.mxu0 %v2389_v43  ;;  %1360 = vmatprep.subr.bf16.mxu1 %v2389_v43  ;;  %v2432_v43 = vld [vmem:[#allocation2 + $0x2f0] ss:$8 sps:$4 sm:$0xff]  }
 0x20b   : > { %v737_v48 = vpop.f32.mrb[4].mxu0  ;;  %v786_v49 = vpop.f32.mrb[4].mxu1 }
 0x20c   : > { %v738_v50 = vadd.f32 %v737_v48, %v536_v46  ;;  %v787_v51 = vadd.f32 %v786_v49, %v536_v46  ;;  %v739_v52 = vpop.f32.mrb[5].mxu0  ;;  %v788_v53 = vpop.f32.mrb[5].mxu1 }
 0x20d   : > { %v740_v54 = vadd.f32 %v739_v52, %v540_v47  ;;  %v789_v55 = vadd.f32 %v788_v53, %v540_v47  ;;  %v741_v56 = vpop.f32.mrb[6].mxu0  ;;  %v790_v57 = vpop.f32.mrb[6].mxu1 }
 0x20e   : > { %v742_v58 = vadd.f32 %v741_v56, %v536_v46  ;;  %v791_v59 = vadd.f32 %v790_v57, %v536_v46  ;;  %v743_v60 = vpop.f32.mrb[7].mxu0  ;;  %v792_v61 = vpop.f32.mrb[7].mxu1  ;;  %v746_v0 = vmax.f32 %v738_v50, 0.0  ;;  %v795_v1 = vmax.f32 %v787_v51, 0.0  ;;  %v2050_v46 = vld [vmem:[%s2899_s4 + $0x2] sm:$0x3] }
 0x20f   : > { %v744_v62 = vadd.f32 %v743_v60, %v540_v47  ;;  %v793_v63 = vadd.f32 %v792_v61, %v540_v47  ;;  %v747_v4 = vmax.f32 %v740_v54, 0.0  ;;  %v796_v5 = vmax.f32 %v789_v55, 0.0 }
 0x210   : > { %v748_v2 = vmax.f32 %v742_v58, 0.0  ;;  %v797_v3 = vmax.f32 %v791_v59, 0.0  ;;  %v840_v47 = vrot.slane %v2050_v46, %v2813_v42  ;;  %v844_v48 = vrot.slane %v2050_v46, %v2818_v44  ;;  %v2483_v46 = vld [vmem:[#allocation5 + $0x40] sm:$0xff]  }
 0x211   : > { %v749_v6 = vmax.f32 %v744_v62, 0.0  ;;  %v798_v7 = vmax.f32 %v793_v63, 0.0 }
 0x212   : > { %v750_v8 = vpack.c.bf16 %v748_v2, %v746_v0  ;;  %v799_v9 = vpack.c.bf16 %v797_v3, %v795_v1 }
 0x213   : > { %v751_v10 = vpack.c.bf16 %v749_v6, %v747_v4  ;;  %v800_v11 = vpack.c.bf16 %v798_v7, %v796_v5 }
 0x215   : > { %1039 = vmatprep.mubr.bf16.mxu0 %v751_v10  ;;  %1088 = vmatprep.mubr.bf16.mxu1 %v800_v11 }
 0x216   : > { %1040 = vmatmul.mubr.bf16.vlgmr.msra.gmra.mrb[8].mxu0 %v750_v8  ;;  %1089 = vmatmul.mubr.bf16.vlgmr.msra.gmra.mrb[8].mxu1 %v799_v9 }
 0x217   : > { %1312 = vmatpush1.bf16.msra.mxu0 %v2387_v12  ;;  %1361 = vmatpush1.bf16.msra.mxu1 %v2387_v12 }
 0x218   : > { %1313 = vmatprep.subr.bf16.mxu0 %v2392_v13  ;;  %1362 = vmatprep.subr.bf16.mxu1 %v2392_v13  ;;  %v2435_v13 = vld [vmem:[#allocation2 + $0x300] ss:$8 sps:$4 sm:$0xff]  }
 0x21b   : > { %1314 = vmatpush1.bf16.msra.mxu0 %v2390_v14  ;;  %1363 = vmatpush1.bf16.msra.mxu1 %v2390_v14  ;;  %v2440_v14 = vld [vmem:[#allocation2 + $0x314] ss:$8 sps:$4 sm:$0xff]  }
 0x21c   : > { %1315 = vmatprep.subr.bf16.mxu0 %v2395_v15  ;;  %1364 = vmatprep.subr.bf16.mxu1 %v2395_v15  ;;  %v2438_v15 = vld [vmem:[#allocation2 + $0x310] ss:$8 sps:$4 sm:$0xff]  }
 0x21f   : > { %1316 = vmatpush1.bf16.msra.mxu0 %v2393_v16  ;;  %1365 = vmatpush1.bf16.msra.mxu1 %v2393_v16  ;;  %v2443_v16 = vld [vmem:[#allocation2 + $0x324] ss:$8 sps:$4 sm:$0xff]  }
 0x220   : > { %1317 = vmatprep.subr.bf16.mxu0 %v2398_v17  ;;  %1366 = vmatprep.subr.bf16.mxu1 %v2398_v17  ;;  %v2441_v17 = vld [vmem:[#allocation2 + $0x320] ss:$8 sps:$4 sm:$0xff]  }
 0x223   : > { %1318 = vmatpush1.bf16.msra.mxu0 %v2396_v18  ;;  %1367 = vmatpush1.bf16.msra.mxu1 %v2396_v18  ;;  %v2446_v18 = vld [vmem:[#allocation2 + $0x334] ss:$8 sps:$4 sm:$0xff]  }
 0x224   : > { %1319 = vmatprep.subr.bf16.mxu0 %v2401_v19  ;;  %1368 = vmatprep.subr.bf16.mxu1 %v2401_v19  ;;  %v2444_v19 = vld [vmem:[#allocation2 + $0x330] ss:$8 sps:$4 sm:$0xff]  }
 0x227   : > { %1320 = vmatpush1.bf16.msra.mxu0 %v2399_v20  ;;  %1369 = vmatpush1.bf16.msra.mxu1 %v2399_v20  ;;  %v2449_v20 = vld [vmem:[#allocation2 + $0x344] ss:$8 sps:$4 sm:$0xff]  }
 0x228   : > { %1321 = vmatprep.subr.bf16.mxu0 %v2404_v21  ;;  %1370 = vmatprep.subr.bf16.mxu1 %v2404_v21  ;;  %v2447_v21 = vld [vmem:[#allocation2 + $0x340] ss:$8 sps:$4 sm:$0xff]  }
 0x22b   : > { %1322 = vmatpush1.bf16.msra.mxu0 %v2402_v22  ;;  %1371 = vmatpush1.bf16.msra.mxu1 %v2402_v22  ;;  %v2452_v22 = vld [vmem:[#allocation2 + $0x354] ss:$8 sps:$4 sm:$0xff]  }
 0x22c   : > { %1323 = vmatprep.subr.bf16.mxu0 %v2407_v23  ;;  %1372 = vmatprep.subr.bf16.mxu1 %v2407_v23  ;;  %v2450_v23 = vld [vmem:[#allocation2 + $0x350] ss:$8 sps:$4 sm:$0xff]  }
 0x22f   : > { %1324 = vmatpush1.bf16.msra.mxu0 %v2405_v24  ;;  %1373 = vmatpush1.bf16.msra.mxu1 %v2405_v24  ;;  %v2455_v24 = vld [vmem:[#allocation2 + $0x364] ss:$8 sps:$4 sm:$0xff]  }
 0x230   : > { %1325 = vmatprep.subr.bf16.mxu0 %v2410_v25  ;;  %1374 = vmatprep.subr.bf16.mxu1 %v2410_v25  ;;  %v2453_v25 = vld [vmem:[#allocation2 + $0x360] ss:$8 sps:$4 sm:$0xff]  }
 0x233   : > { %1326 = vmatpush1.bf16.msra.mxu0 %v2408_v26  ;;  %1375 = vmatpush1.bf16.msra.mxu1 %v2408_v26  ;;  %v2458_v26 = vld [vmem:[#allocation2 + $0x374] ss:$8 sps:$4 sm:$0xff]  }
 0x234   : > { %1327 = vmatprep.subr.bf16.mxu0 %v2413_v27  ;;  %1376 = vmatprep.subr.bf16.mxu1 %v2413_v27  ;;  %v2456_v27 = vld [vmem:[#allocation2 + $0x370] ss:$8 sps:$4 sm:$0xff]  }
 0x237   : > { %1328 = vmatpush1.bf16.msra.mxu0 %v2411_v28  ;;  %1377 = vmatpush1.bf16.msra.mxu1 %v2411_v28  ;;  %v2461_v28 = vld [vmem:[#allocation2 + $0x384] ss:$8 sps:$4 sm:$0xff]  }
 0x238   : > { %1329 = vmatprep.subr.bf16.mxu0 %v2416_v29  ;;  %1378 = vmatprep.subr.bf16.mxu1 %v2416_v29  ;;  %v2459_v29 = vld [vmem:[#allocation2 + $0x380] ss:$8 sps:$4 sm:$0xff]  }
 0x23b   : > { %1330 = vmatpush1.bf16.msra.mxu0 %v2414_v30  ;;  %1379 = vmatpush1.bf16.msra.mxu1 %v2414_v30  ;;  %v2464_v30 = vld [vmem:[#allocation2 + $0x394] ss:$8 sps:$4 sm:$0xff]  }
 0x23c   : > { %1331 = vmatprep.subr.bf16.mxu0 %v2419_v31  ;;  %1380 = vmatprep.subr.bf16.mxu1 %v2419_v31  ;;  %v2462_v31 = vld [vmem:[#allocation2 + $0x390] ss:$8 sps:$4 sm:$0xff]  }
 0x23f   : > { %1332 = vmatpush1.bf16.msra.mxu0 %v2417_v32  ;;  %1381 = vmatpush1.bf16.msra.mxu1 %v2417_v32  ;;  %v2467_v32 = vld [vmem:[#allocation2 + $0x3a4] ss:$8 sps:$4 sm:$0xff]  }
 0x240   : > { %1333 = vmatprep.subr.bf16.mxu0 %v2422_v33  ;;  %1382 = vmatprep.subr.bf16.mxu1 %v2422_v33  ;;  %v2465_v33 = vld [vmem:[#allocation2 + $0x3a0] ss:$8 sps:$4 sm:$0xff]  }
 0x243   : > { %1334 = vmatpush1.bf16.msra.mxu0 %v2420_v34  ;;  %1383 = vmatpush1.bf16.msra.mxu1 %v2420_v34  ;;  %v2470_v34 = vld [vmem:[#allocation2 + $0x3b4] ss:$8 sps:$4 sm:$0xff]  }
 0x244   : > { %1335 = vmatprep.subr.bf16.mxu0 %v2425_v35  ;;  %1384 = vmatprep.subr.bf16.mxu1 %v2425_v35  ;;  %v2468_v35 = vld [vmem:[#allocation2 + $0x3b0] ss:$8 sps:$4 sm:$0xff]  }
 0x247   : > { %1336 = vmatpush1.bf16.msra.mxu0 %v2423_v36  ;;  %1385 = vmatpush1.bf16.msra.mxu1 %v2423_v36  ;;  %v2473_v36 = vld [vmem:[#allocation2 + $0x3c4] ss:$8 sps:$4 sm:$0xff]  }
 0x248   : > { %1337 = vmatprep.subr.bf16.mxu0 %v2428_v37  ;;  %1386 = vmatprep.subr.bf16.mxu1 %v2428_v37  ;;  %v2471_v37 = vld [vmem:[#allocation2 + $0x3c0] ss:$8 sps:$4 sm:$0xff]  }
 0x24b   : > { %1338 = vmatpush1.bf16.msra.mxu0 %v2426_v38  ;;  %1387 = vmatpush1.bf16.msra.mxu1 %v2426_v38  ;;  %v2476_v38 = vld [vmem:[#allocation2 + $0x3d4] ss:$8 sps:$4 sm:$0xff]  }
 0x24c   : > { %1339 = vmatprep.subr.bf16.mxu0 %v2431_v39  ;;  %1388 = vmatprep.subr.bf16.mxu1 %v2431_v39  ;;  %v2474_v39 = vld [vmem:[#allocation2 + $0x3d0] ss:$8 sps:$4 sm:$0xff]  }
 0x24f   : > { %1340 = vmatpush1.bf16.msra.mxu0 %v2429_v40  ;;  %1389 = vmatpush1.bf16.msra.mxu1 %v2429_v40  ;;  %v2479_v40 = vld [vmem:[#allocation2 + $0x3e4] ss:$8 sps:$4 sm:$0xff]  }
 0x250   : > { %1341 = vmatprep.subr.bf16.mxu0 %v2434_v41  ;;  %1390 = vmatprep.subr.bf16.mxu1 %v2434_v41  ;;  %v2477_v41 = vld [vmem:[#allocation2 + $0x3e0] ss:$8 sps:$4 sm:$0xff]  }
 0x253   : > { %1342 = vmatpush1.bf16.msra.mxu0 %v2432_v43  ;;  %1391 = vmatpush1.bf16.msra.mxu1 %v2432_v43  ;;  %v2482_v43 = vld [vmem:[#allocation2 + $0x3f4] ss:$8 sps:$4 sm:$0xff]  }
 0x254   : > { %1615 = vmatprep.subr.bf16.mxu0 %v2437_v45  ;;  %1664 = vmatprep.subr.bf16.mxu1 %v2437_v45  ;;  %v2480_v45 = vld [vmem:[#allocation2 + $0x3f0] ss:$8 sps:$4 sm:$0xff]  }
 0x2e9   : > { %v1041_v49 = vpop.f32.mrb[8].mxu0  ;;  %v1090_v50 = vpop.f32.mrb[8].mxu1 }
 0x2ea   : > { %v1042_v51 = vadd.f32 %v1041_v49, %v840_v47  ;;  %v1091_v52 = vadd.f32 %v1090_v50, %v840_v47  ;;  %v1043_v53 = vpop.f32.mrb[9].mxu0  ;;  %v1092_v54 = vpop.f32.mrb[9].mxu1 }
 0x2eb   : > { %v1044_v55 = vadd.f32 %v1043_v53, %v844_v48  ;;  %v1093_v56 = vadd.f32 %v1092_v54, %v844_v48  ;;  %v1045_v57 = vpop.f32.mrb[10].mxu0  ;;  %v1094_v58 = vpop.f32.mrb[10].mxu1 }
 0x2ec   : > { %v1046_v59 = vadd.f32 %v1045_v57, %v840_v47  ;;  %v1095_v60 = vadd.f32 %v1094_v58, %v840_v47  ;;  %v1047_v61 = vpop.f32.mrb[11].mxu0  ;;  %v1096_v62 = vpop.f32.mrb[11].mxu1  ;;  %v1050_v1 = vmax.f32 %v1042_v51, 0.0  ;;  %v1099_v2 = vmax.f32 %v1091_v52, 0.0  ;;  %v2083_v47 = vld [vmem:[%s2899_s4 + $0x4] sm:$0x3] }
 0x2ed   : > { %v1048_v63 = vadd.f32 %v1047_v61, %v844_v48  ;;  %v1097_v0 = vadd.f32 %v1096_v62, %v844_v48  ;;  %v1051_v5 = vmax.f32 %v1044_v55, 0.0  ;;  %v1100_v6 = vmax.f32 %v1093_v56, 0.0 }
 0x2ee   : > { %v1052_v3 = vmax.f32 %v1046_v59, 0.0  ;;  %v1101_v4 = vmax.f32 %v1095_v60, 0.0  ;;  %v1144_v48 = vrot.slane %v2083_v47, %v2813_v42  ;;  %v1148_v49 = vrot.slane %v2083_v47, %v2818_v44 }
 0x2ef   : > { %v1053_v7 = vmax.f32 %v1048_v63, 0.0  ;;  %v1102_v8 = vmax.f32 %v1097_v0, 0.0 }
 0x2f0   : > { %v1054_v9 = vpack.c.bf16 %v1052_v3, %v1050_v1  ;;  %v1103_v10 = vpack.c.bf16 %v1101_v4, %v1099_v2 }
 0x2f1   : > { %v1055_v11 = vpack.c.bf16 %v1053_v7, %v1051_v5  ;;  %v1104_v12 = vpack.c.bf16 %v1102_v8, %v1100_v6 }
 0x2f3   : > { %1343 = vmatprep.mubr.bf16.mxu0 %v1055_v11  ;;  %1392 = vmatprep.mubr.bf16.mxu1 %v1104_v12 }
 0x2f4   : > { %1344 = vmatmul.mubr.bf16.vlgmr.msra.gmra.mrb[12].mxu0 %v1054_v9  ;;  %1393 = vmatmul.mubr.bf16.vlgmr.msra.gmra.mrb[12].mxu1 %v1103_v10 }
 0x2f5   : > { %1616 = vmatpush1.bf16.msra.mxu0 %v2435_v13  ;;  %1665 = vmatpush1.bf16.msra.mxu1 %v2435_v13 }
 0x2f6   : > { %1617 = vmatprep.subr.bf16.mxu0 %v2440_v14  ;;  %1666 = vmatprep.subr.bf16.mxu1 %v2440_v14  ;;  %v2484_v14 = vld [vmem:[#allocation5] sm:$0xff]  }
 0x2f9   : > { %1618 = vmatpush1.bf16.msra.mxu0 %v2438_v15  ;;  %1667 = vmatpush1.bf16.msra.mxu1 %v2438_v15  ;;  %v2485_v15 = vld [vmem:[#allocation5 + $0x48] sm:$0xff]  }
 0x2fa   : > { %1619 = vmatprep.subr.bf16.mxu0 %v2443_v16  ;;  %1668 = vmatprep.subr.bf16.mxu1 %v2443_v16  ;;  %v2486_v16 = vld [vmem:[#allocation5 + $0x8] sm:$0xff]  }
 0x2fd   : > { %1620 = vmatpush1.bf16.msra.mxu0 %v2441_v17  ;;  %1669 = vmatpush1.bf16.msra.mxu1 %v2441_v17  ;;  %v2487_v17 = vld [vmem:[#allocation5 + $0x50] sm:$0xff]  }
 0x2fe   : > { %1621 = vmatprep.subr.bf16.mxu0 %v2446_v18  ;;  %1670 = vmatprep.subr.bf16.mxu1 %v2446_v18  ;;  %v2488_v18 = vld [vmem:[#allocation5 + $0x10] sm:$0xff]  }
 0x301   : > { %1622 = vmatpush1.bf16.msra.mxu0 %v2444_v19  ;;  %1671 = vmatpush1.bf16.msra.mxu1 %v2444_v19  ;;  %v2489_v19 = vld [vmem:[#allocation5 + $0x58] sm:$0xff]  }
 0x302   : > { %1623 = vmatprep.subr.bf16.mxu0 %v2449_v20  ;;  %1672 = vmatprep.subr.bf16.mxu1 %v2449_v20  ;;  %v2490_v20 = vld [vmem:[#allocation5 + $0x18] sm:$0xff]  }
 0x305   : > { %1624 = vmatpush1.bf16.msra.mxu0 %v2447_v21  ;;  %1673 = vmatpush1.bf16.msra.mxu1 %v2447_v21  ;;  %v2491_v21 = vld [vmem:[#allocation5 + $0x60] sm:$0xff]  }
 0x306   : > { %1625 = vmatprep.subr.bf16.mxu0 %v2452_v22  ;;  %1674 = vmatprep.subr.bf16.mxu1 %v2452_v22  ;;  %v2492_v22 = vld [vmem:[#allocation5 + $0x20] sm:$0xff]  }
 0x309   : > { %1626 = vmatpush1.bf16.msra.mxu0 %v2450_v23  ;;  %1675 = vmatpush1.bf16.msra.mxu1 %v2450_v23  ;;  %v2493_v23 = vld [vmem:[#allocation5 + $0x68] sm:$0xff]  }
 0x30a   : > { %1627 = vmatprep.subr.bf16.mxu0 %v2455_v24  ;;  %1676 = vmatprep.subr.bf16.mxu1 %v2455_v24  ;;  %v2494_v24 = vld [vmem:[#allocation5 + $0x28] sm:$0xff]  }
 0x30d   : > { %1628 = vmatpush1.bf16.msra.mxu0 %v2453_v25  ;;  %1677 = vmatpush1.bf16.msra.mxu1 %v2453_v25  ;;  %v2495_v25 = vld [vmem:[#allocation5 + $0x70] sm:$0xff]  }
 0x30e   : > { %1629 = vmatprep.subr.bf16.mxu0 %v2458_v26  ;;  %1678 = vmatprep.subr.bf16.mxu1 %v2458_v26  ;;  %v2496_v26 = vld [vmem:[#allocation5 + $0x30] sm:$0xff]  }
 0x311   : > { %1630 = vmatpush1.bf16.msra.mxu0 %v2456_v27  ;;  %1679 = vmatpush1.bf16.msra.mxu1 %v2456_v27  ;;  %v2497_v27 = vld [vmem:[#allocation5 + $0x78] sm:$0xff]  }
 0x312   : > { %1631 = vmatprep.subr.bf16.mxu0 %v2461_v28  ;;  %1680 = vmatprep.subr.bf16.mxu1 %v2461_v28  ;;  %v2498_v28 = vld [vmem:[#allocation5 + $0x38] sm:$0xff]  }
 0x315   : > { %1632 = vmatpush1.bf16.msra.mxu0 %v2459_v29  ;;  %1681 = vmatpush1.bf16.msra.mxu1 %v2459_v29  ;;  %v2116_v29 = vld [vmem:[%s2899_s4 + $0x6] sm:$0x3] }
 0x316   : > { %1633 = vmatprep.subr.bf16.mxu0 %v2464_v30  ;;  %1682 = vmatprep.subr.bf16.mxu1 %v2464_v30  ;;  %v1448_v30 = vrot.slane %v2116_v29, %v2813_v42 }
 0x319   : > { %1634 = vmatpush1.bf16.msra.mxu0 %v2462_v31  ;;  %1683 = vmatpush1.bf16.msra.mxu1 %v2462_v31  ;;  %v1452_v31 = vrot.slane %v2116_v29, %v2818_v44 }
 0x31a   : > { %1635 = vmatprep.subr.bf16.mxu0 %v2467_v32  ;;  %1684 = vmatprep.subr.bf16.mxu1 %v2467_v32 }
 0x31d   : > { %1636 = vmatpush1.bf16.msra.mxu0 %v2465_v33  ;;  %1685 = vmatpush1.bf16.msra.mxu1 %v2465_v33 }
 0x31e   : > { %1637 = vmatprep.subr.bf16.mxu0 %v2470_v34  ;;  %1686 = vmatprep.subr.bf16.mxu1 %v2470_v34 }
 0x321   : > { %1638 = vmatpush1.bf16.msra.mxu0 %v2468_v35  ;;  %1687 = vmatpush1.bf16.msra.mxu1 %v2468_v35 }
 0x322   : > { %1639 = vmatprep.subr.bf16.mxu0 %v2473_v36  ;;  %1688 = vmatprep.subr.bf16.mxu1 %v2473_v36 }
 0x325   : > { %1640 = vmatpush1.bf16.msra.mxu0 %v2471_v37  ;;  %1689 = vmatpush1.bf16.msra.mxu1 %v2471_v37 }
 0x326   : > { %1641 = vmatprep.subr.bf16.mxu0 %v2476_v38  ;;  %1690 = vmatprep.subr.bf16.mxu1 %v2476_v38 }
 0x329   : > { %1642 = vmatpush1.bf16.msra.mxu0 %v2474_v39  ;;  %1691 = vmatpush1.bf16.msra.mxu1 %v2474_v39 }
 0x32a   : > { %1643 = vmatprep.subr.bf16.mxu0 %v2479_v40  ;;  %1692 = vmatprep.subr.bf16.mxu1 %v2479_v40 }
 0x32d   : > { %1644 = vmatpush1.bf16.msra.mxu0 %v2477_v41  ;;  %1693 = vmatpush1.bf16.msra.mxu1 %v2477_v41 }
 0x32e   : > { %1645 = vmatprep.subr.bf16.mxu0 %v2482_v43  ;;  %1694 = vmatprep.subr.bf16.mxu1 %v2482_v43 }
 0x331   : > { %1646 = vmatpush1.bf16.msra.mxu0 %v2480_v45  ;;  %1695 = vmatpush1.bf16.msra.mxu1 %v2480_v45 }
 0x332   : > { %2172 = vmatprep.subr.bf16.mxu0 %v2483_v46  ;;  %2194 = vmatprep.subr.bf16.mxu1 %v2483_v46 }
 0x3c7   : > { %v1345_v50 = vpop.f32.mrb[12].mxu0  ;;  %v1394_v51 = vpop.f32.mrb[12].mxu1 }
 0x3c8   : > { %v1346_v52 = vadd.f32 %v1345_v50, %v1144_v48  ;;  %v1395_v53 = vadd.f32 %v1394_v51, %v1144_v48  ;;  %v1347_v54 = vpop.f32.mrb[13].mxu0  ;;  %v1396_v55 = vpop.f32.mrb[13].mxu1 }
 0x3c9   : > { %v1348_v56 = vadd.f32 %v1347_v54, %v1148_v49  ;;  %v1397_v57 = vadd.f32 %v1396_v55, %v1148_v49  ;;  %v1349_v58 = vpop.f32.mrb[14].mxu0  ;;  %v1398_v59 = vpop.f32.mrb[14].mxu1 }
 0x3ca   : > { %v1350_v60 = vadd.f32 %v1349_v58, %v1144_v48  ;;  %v1399_v61 = vadd.f32 %v1398_v59, %v1144_v48  ;;  %v1351_v62 = vpop.f32.mrb[15].mxu0  ;;  %v1400_v63 = vpop.f32.mrb[15].mxu1  ;;  %v1354_v2 = vmax.f32 %v1346_v52, 0.0  ;;  %v1403_v3 = vmax.f32 %v1395_v53, 0.0 }
 0x3cb   : > { %v1352_v0 = vadd.f32 %v1351_v62, %v1148_v49  ;;  %v1401_v1 = vadd.f32 %v1400_v63, %v1148_v49  ;;  %v1355_v6 = vmax.f32 %v1348_v56, 0.0  ;;  %v1404_v7 = vmax.f32 %v1397_v57, 0.0  ;;  %v2149_v62 = vld [vmem:[%s2901_s6] ss:$0 sm:$0xff] }
 0x3cc   : > { %v1356_v4 = vmax.f32 %v1350_v60, 0.0  ;;  %v1405_v5 = vmax.f32 %v1399_v61, 0.0 }
 0x3cd   : > { %v1357_v8 = vmax.f32 %v1352_v0, 0.0  ;;  %v1406_v9 = vmax.f32 %v1401_v1, 0.0 }
 0x3ce   : > { %v1358_v10 = vpack.c.bf16 %v1356_v4, %v1354_v2  ;;  %v1407_v11 = vpack.c.bf16 %v1405_v5, %v1403_v3 }
 0x3cf   : > { %v1359_v12 = vpack.c.bf16 %v1357_v8, %v1355_v6  ;;  %v1408_v13 = vpack.c.bf16 %v1406_v9, %v1404_v7 }
 0x3d1   : > { %1647 = vmatprep.mubr.bf16.mxu0 %v1359_v12  ;;  %1696 = vmatprep.mubr.bf16.mxu1 %v1408_v13 }
 0x3d2   : > { %1648 = vmatmul.mubr.bf16.vlgmr.msra.gmra.mrb[16].mxu0 %v1358_v10  ;;  %1697 = vmatmul.mubr.bf16.vlgmr.msra.gmra.mrb[16].mxu1 %v1407_v11 }
 0x3d3   : > { %2173 = vmatpush3.bf16.msra.mxu0 %v2484_v14  ;;  %2195 = vmatpush3.bf16.msra.mxu1 %v2484_v14 }
 0x3d4   : > { %2174 = vmatprep.subr.bf16.mxu0 %v2485_v15  ;;  %2196 = vmatprep.subr.bf16.mxu1 %v2485_v15 }
 0x3d7   : > { %2175 = vmatpush3.bf16.msra.mxu0 %v2486_v16  ;;  %2197 = vmatpush3.bf16.msra.mxu1 %v2486_v16 }
 0x3d8   : > { %2176 = vmatprep.subr.bf16.mxu0 %v2487_v17  ;;  %2198 = vmatprep.subr.bf16.mxu1 %v2487_v17 }
 0x3db   : > { %2177 = vmatpush3.bf16.msra.mxu0 %v2488_v18  ;;  %2199 = vmatpush3.bf16.msra.mxu1 %v2488_v18 }
 0x3dc   : > { %2178 = vmatprep.subr.bf16.mxu0 %v2489_v19  ;;  %2200 = vmatprep.subr.bf16.mxu1 %v2489_v19 }
 0x3df   : > { %2179 = vmatpush3.bf16.msra.mxu0 %v2490_v20  ;;  %2201 = vmatpush3.bf16.msra.mxu1 %v2490_v20 }
 0x3e0   : > { %2180 = vmatprep.subr.bf16.mxu0 %v2491_v21  ;;  %2202 = vmatprep.subr.bf16.mxu1 %v2491_v21 }
 0x3e3   : > { %2181 = vmatpush3.bf16.msra.mxu0 %v2492_v22  ;;  %2203 = vmatpush3.bf16.msra.mxu1 %v2492_v22 }
 0x3e4   : > { %2182 = vmatprep.subr.bf16.mxu0 %v2493_v23  ;;  %2204 = vmatprep.subr.bf16.mxu1 %v2493_v23 }
 0x3e7   : > { %2183 = vmatpush3.bf16.msra.mxu0 %v2494_v24  ;;  %2205 = vmatpush3.bf16.msra.mxu1 %v2494_v24 }
 0x3e8   : > { %2184 = vmatprep.subr.bf16.mxu0 %v2495_v25  ;;  %2206 = vmatprep.subr.bf16.mxu1 %v2495_v25 }
 0x3eb   : > { %2185 = vmatpush3.bf16.msra.mxu0 %v2496_v26  ;;  %2207 = vmatpush3.bf16.msra.mxu1 %v2496_v26 }
 0x3ec   : > { %2186 = vmatprep.subr.bf16.mxu0 %v2497_v27  ;;  %2208 = vmatprep.subr.bf16.mxu1 %v2497_v27 }
 0x3ef   : > { %2187 = vmatpush3.bf16.msra.mxu0 %v2498_v28  ;;  %2209 = vmatpush3.bf16.msra.mxu1 %v2498_v28 }
 0x4a5   : > { %v1649_v32 = vpop.f32.mrb[16].mxu0  ;;  %v1698_v33 = vpop.f32.mrb[16].mxu1 }
 0x4a6   : > { %v1650_v34 = vadd.f32 %v1649_v32, %v1448_v30  ;;  %v1699_v35 = vadd.f32 %v1698_v33, %v1448_v30  ;;  %v1651_v36 = vpop.f32.mrb[17].mxu0  ;;  %v1700_v37 = vpop.f32.mrb[17].mxu1 }
 0x4a7   : > { %v1652_v38 = vadd.f32 %v1651_v36, %v1452_v31  ;;  %v1701_v39 = vadd.f32 %v1700_v37, %v1452_v31  ;;  %v1653_v40 = vpop.f32.mrb[18].mxu0  ;;  %v1702_v41 = vpop.f32.mrb[18].mxu1 }
 0x4a8   : > { %v1654_v43 = vadd.f32 %v1653_v40, %v1448_v30  ;;  %v1703_v45 = vadd.f32 %v1702_v41, %v1448_v30  ;;  %v1655_v46 = vpop.f32.mrb[19].mxu0  ;;  %v1704_v47 = vpop.f32.mrb[19].mxu1  ;;  %v1658_v50 = vmax.f32 %v1650_v34, 0.0  ;;  %v1707_v42 = vmax.f32 %v1699_v35, 0.0 }
 0x4a9   : > { %v1656_v48 = vadd.f32 %v1655_v46, %v1452_v31  ;;  %v1705_v49 = vadd.f32 %v1704_v47, %v1452_v31  ;;  %v1659_v52 = vmax.f32 %v1652_v38, 0.0  ;;  %v1708_v53 = vmax.f32 %v1701_v39, 0.0 }
 0x4aa   : > { %v1660_v44 = vmax.f32 %v1654_v43, 0.0  ;;  %v1709_v51 = vmax.f32 %v1703_v45, 0.0 }
 0x4ab   : > { %v1661_v54 = vmax.f32 %v1656_v48, 0.0  ;;  %v1710_v55 = vmax.f32 %v1705_v49, 0.0 }
 0x4ac   : > { %v1662_v56 = vpack.c.bf16 %v1660_v44, %v1658_v50  ;;  %v1711_v57 = vpack.c.bf16 %v1709_v51, %v1707_v42 }
 0x4ad   : > { %v1663_v58 = vpack.c.bf16 %v1661_v54, %v1659_v52  ;;  %v1712_v59 = vpack.c.bf16 %v1710_v55, %v1708_v53 }
 0x4af   : > { %1847 = vmatprep.mubr.bf16.mxu0 %v1663_v58  ;;  %1890 = vmatprep.mubr.bf16.mxu1 %v1712_v59 }
 0x4b0   : > { %1848 = vmatmul.mubr.bf16.vlgmr.msra.gmra.mrb[20].mxu0 %v1662_v56  ;;  %1891 = vmatmul.mubr.bf16.vlgmr.msra.gmra.mrb[20].mxu1 %v1711_v57 }
 0x583   : > { %v2188_v60 = vpop.f32.mrb[20].mxu0  ;;  %v2210_v61 = vpop.f32.mrb[20].mxu1 }
 0x584   : > { %v2189_v63 = vpop.f32.mrb[21].mxu0  ;;  %v2211_v0 = vpop.f32.mrb[21].mxu1 }
 0x585   : > { %v2190_v1 = vadd.f32 %v2189_v63, %v2188_v60  ;;  %v2212_v2 = vadd.f32 %v2211_v0, %v2210_v61  ;;  %v2191_v3 = vpop.f32.mrb[22].mxu0  ;;  %v2213_v4 = vpop.f32.mrb[22].mxu1 }
 0x586   : > { %v2192_v5 = vpop.f32.mrb[23].mxu0  ;;  %v2214_v6 = vpop.f32.mrb[23].mxu1 }
 0x587   : > { %v1850_v7 = vadd.f32 %v2190_v1, %v2149_v62  ;;  %v1893_v8 = vadd.f32 %v2212_v2, %v2149_v62  ;;  %v2193_v9 = vadd.f32 %v2192_v5, %v2191_v3  ;;  %v2215_v10 = vadd.f32 %v2214_v6, %v2213_v4 }
 0x589   : > { %1856 = vst [vmem:[%s302_s14] sm:$0xff] %v1850_v7  ;;  %1899 = vst [vmem:[%s302_s14 + $0x10] sm:$0xff] %v1893_v8  ;;  %v1853_v11 = vadd.f32 %v2193_v9, %v2149_v62  ;;  %v1896_v12 = vadd.f32 %v2215_v10, %v2149_v62 }
 0x58b   : > { %1857 = vst [vmem:[%s302_s14 + $0x8] sm:$0xff] %v1853_v11  ;;  %1900 = vst [vmem:[%s302_s14 + $0x18] sm:$0xff] %v1896_v12 }
 0x58c   : > { %2568 = shalt.err (!%p2565_p11)
}
 0x58d   : > { %s2569_s29 = scalar_lea.hbm %s2852_s18, 512  ;;  %s2573_s15 = scalar_lea.hbm %s2902_s7, 1024 }
 0x58e   : > { %p2570_p13 = scmp.ne.s32.totalorder %s2852_s18, %s2569_s29  ;;  %p2574_p6 = scmp.lt.u32.totalorder %s2852_s18, %s2902_s7 }
 0x58f   : > { %p2575_p9 = scmp.lt.u32.totalorder %s2573_s15, %s2569_s29  ;;  %p2577_p10 = scmp.lt.u32.totalorder %s2569_s29, %s2852_s18 }
 0x590   : > { %p2571_p0 = pnand %p2570_p13, %p2916_p1 }
 0x591   : > { %p2576_p12 = por %p2575_p9, %p2574_p6 }
 0x592   : > { %p2572_p5 = pneg %p2571_p0 }
 0x593   : > { %p2578_p2 = por %p2577_p10, %p2576_p12 }
 0x595   : > { %p2579_p3 = pnand %p2578_p2, %p2572_p5 }
 0x597   : > { %2582 = shalt.err (!%p2579_p3)
}
 0x598   : > { %s2635_s19 = smov 128   ;;  %s2636_s16 = smov 8  }
 0x599   : > { %2224 = dma.vmem_to_hbm [thread:$0]  (%p2916_p1), %s2847_s17, 512, %s2852_s18, %s2854_s28, %s2635_s19, %s2635_s19, %s2636_s16  }
 0x59a PF: > { %p2241_p4 = scmp.ge.s32.totalorder %s2625_s27, 2  ;;  %s1930_s13 = sand.u32 1, %s2613_s24  }
 0x59b   : > { %p2917_p7 = scmp.ne.s32.totalorder %s2908_s12, 0  ;;  %s1931_s20 = scalar_lea.sflag [#allocation4], %s1930_s13 }
 0x59d   : > { %p2234_p8 = pnand %p2241_p4, %p2917_p7 }
 0x59f   : > { %2608 = dma.done.wait (!%p2234_p8), %s1931_s20, 512  }
 0x5a0   : > { %2610 = vsyncadd (!%p2234_p8), %s1931_s20, 4294966784  ;;  %s2918_s21 = sld [smem:[#allocation11_spill]]  ;;  %p19_p11 = scmp.ge.s32.totalorder %s2702_s30, 4  }
 0x5a1   : > { %s2919_s24 = smov %s2617_s25  ;;  %s2920_s25 = smov %s2621_s26 }
 0x5a2   : > { %s2922_s27 = smov %s2702_s30  ;;  %21 = sbr.rel (!%p19_p11) target bundleno = 5 (0x5), region = 98 }
 0x5a6   : > { %s2921_s26 = smov %s2918_s21 }
 0x5a9   :  { %1936 = vsyncpa [#allocation3], 1 }
 0x5aa   :  { %1938 = vsyncpa [#allocation3 + $0x1], 1 }
 0x5ab   :  { %1939 = vsyncpa [#allocation6], 1 }
 0x5ac   :  { %1940 = vsyncpa [#allocation4], 1 }
 0x5ad   :  { %1942 = vsyncpa [#allocation4 + $0x1], 1 }

</bundles_post_ra>
